<compile_context>
chip_gen: v7x
topology: tpu7x:2x2x1
jax: 0.10.0
libtpu: 0.0.40
codegen_flags: <defaults>
</compile_context>

<pallas_src>
import functools
import math

import jax
import jax.numpy as jnp
from jax.experimental import pallas as pl
from jax.experimental.pallas import tpu as pltpu


# --------------------------------------------------------------------------
# Generation-aware VMEM budgeting (v5e/v6e: 128 MiB, v7x: 64 MiB per core).
# --------------------------------------------------------------------------
def _vmem_capacity_bytes():
    try:
        return int(pltpu.get_tpu_info().vmem_capacity_bytes)
    except Exception:                       # conservative fallback (v7x-sized)
        return 64 * 1024 * 1024


def _vmem_limit_bytes():
    cap = _vmem_capacity_bytes()
    # 128 MiB physical -> ~96 MiB scoped limit; 64 MiB physical -> ~48 MiB.
    return min(cap * 3 // 4, 100 * 1024 * 1024)


def _choose_tile_n(n, k, d, cin, in_itemsize, attn_itemsize, emit_attn,
                   vmem_budget_bytes, batch):
    """Largest divisor-of-N tile whose pipelined working set fits the per-core
    VMEM budget; nudged so the grid splits evenly across v7x's 2 TensorCores."""
    def step_bytes(tn):
        tnk = tn * k
        io_in = (tn * d + tnk * 2 * d) * in_itemsize + tnk * 3 * 4 + tn * cin * 4
        io_out = tn * cin * 4 + (tnk * d * attn_itemsize if emit_attn else 0)
        temps = 10 * tnk * d * 4            # live f32 intermediates in-kernel
        return 2 * (io_in + io_out) + temps  # 2x: double-buffered pipeline I/O

    quantum = 8 if in_itemsize >= 4 else 16  # bf16 blocks: keep sublane % 16
    budget = int(vmem_budget_bytes * 0.6)    # headroom for weights + scratch
    cands = sorted({t for t in range(quantum, n + 1, quantum) if n % t == 0}
                   | {n})
    fitting = [t for t in cands if step_bytes(t) <= budget] or [cands[0]]
    tn = max(fitting)
    if (batch * (n // tn)) % 2:              # v7x has 2 TCs: prefer even grid
        even = [t for t in fitting if (batch * (n // t)) % 2 == 0]
        if even:
            tn = max(even)
    return tn


# --------------------------------------------------------------------------
# Kernel 1: fused linear1 + {Q, K, V} projection.
#   host precomputes  Wqkv = W1 @ [Wq | Wk | Wv],  bqkv = b1 @ [Wq | Wk | Wv]
#   so the kernel is one matmul with one lane-dense (3D-wide) output.  In bf16
#   mode, operands AND the emitted qkv slab are bf16 (f32 accumulation).
# --------------------------------------------------------------------------
def _qkv_kernel(feat_ref, wqkv_ref, bqkv_ref, qkv_ref):
    acc = jnp.dot(feat_ref[0], wqkv_ref[...],
                  preferred_element_type=jnp.float32) + bqkv_ref[...]
    qkv_ref[0] = acc.astype(qkv_ref.dtype)


def _project_qkv(features, wqkv, bqkv, tile_n, vmem_limit):
    B, N, Cin = features.shape
    D3 = wqkv.shape[1]
    isz = jnp.dtype(features.dtype).itemsize
    ce = pl.CostEstimate(
        flops=2 * B * N * Cin * D3,
        transcendentals=0,
        bytes_accessed=(B * N * Cin + Cin * D3 + B * N * D3) * isz + D3 * 4)
    return pl.pallas_call(
        _qkv_kernel,
        grid=(B, N // tile_n),
        in_specs=[
            pl.BlockSpec((1, tile_n, Cin), lambda b, n: (b, n, 0)),
            pl.BlockSpec((Cin, D3), lambda b, n: (0, 0)),
            pl.BlockSpec((1, D3), lambda b, n: (0, 0)),
        ],
        out_specs=pl.BlockSpec((1, tile_n, D3), lambda b, n: (b, n, 0)),
        out_shape=jax.ShapeDtypeStruct((B, N, D3), features.dtype),
        compiler_params=pltpu.CompilerParams(
            dimension_semantics=("parallel", "parallel"),
            vmem_limit_bytes=vmem_limit),
        cost_estimate=ce,
    )(features, wqkv, bqkv)


# --------------------------------------------------------------------------
# Kernel 2: positional-encoding MLP + mapping MLP + softmax over K neighbors
#           + weighted aggregation + linear2 + residual, tiled over points.
# Gathered [K|V] and relative coords arrive flat over (N*K) so the matmul path
# never carries a sublane-padded (…, K, D) layout.
# --------------------------------------------------------------------------
def _attn_kernel(emit_attn, q_ref, kv_ref, rel_ref, feat_ref,
                 wp1_ref, bp1_ref, wp2_ref, bp2_ref,
                 wm1_ref, bm1_ref, wm2_ref, bm2_ref,
                 w2_ref, b2_ref, out_ref, *attn_refs):
    tn, d = q_ref.shape[1], q_ref.shape[2]
    tnk = kv_ref.shape[1]
    k = tnk // tn
    cdt = wm1_ref.dtype                      # MXU operand dtype (f32 or bf16)

    # Hoist weight / bias loads once (JAX does not CSE broadcast_in_dim).
    wp1 = wp1_ref[...]                       # (3, D)  f32
    bp1 = bp1_ref[...]                       # (1, D)  f32
    wp2 = wp2_ref[...]                       # (D, D)  cdt
    bp2 = bp2_ref[...]
    wm1 = wm1_ref[...]
    bm1 = bm1_ref[...]
    wm2 = wm2_ref[...]
    bm2 = bm2_ref[...]
    w2 = w2_ref[...]
    b2 = b2_ref[...]

    # ---- positional-encoding MLP on flat (TN*K, 3) relative coords (f32) ----
    # first layer contracts over 3 -> unrolled outer products on the VPU.
    rel = rel_ref[0]
    h = (rel[:, 0:1] * wp1[0:1, :]
         + rel[:, 1:2] * wp1[1:2, :]
         + rel[:, 2:3] * wp1[2:3, :]
         + bp1)                                                # (TNK, D)
    h = jnp.maximum(h, 0.0)
    pos = jnp.dot(h.astype(cdt), wp2,
                  preferred_element_type=jnp.float32) + bp2    # (TNK, D) f32

    # ---- mapping MLP: (q - k + pos) @ Wm1 == q @ Wm1 + (pos - k) @ Wm1 ----
    # avoids materializing a K-times replicated copy of q; one downcast of pos.
    kv = kv_ref[0]                                             # (TNK, 2D) cdt
    kg, vg = kv[:, :d], kv[:, d:]
    qw = jnp.dot(q_ref[0], wm1,
                 preferred_element_type=jnp.float32) + bm1     # (TN, D) f32
    pk = pos.astype(cdt) - kg                                  # (TNK, D) cdt
    m = jnp.dot(pk, wm1, preferred_element_type=jnp.float32)   # (TNK, D) f32
    m = jnp.maximum(m.reshape(tn, k, d) + qw[:, None, :], 0.0).reshape(tnk, d)
    a_flat = (jnp.dot(m.astype(cdt), wm2, preferred_element_type=jnp.float32)
              + bm2)                                           # (TNK, D) f32

    # ---- softmax over the K neighbors (fold K back only here), f32 ----
    a = a_flat.reshape(tn, k, d) * (1.0 / math.sqrt(d))
    a = a - jnp.max(a, axis=1, keepdims=True)
    ea = jnp.exp(a)
    inv = pl.reciprocal(jnp.sum(ea, axis=1, keepdims=True), approx=True)
    attn = ea * inv                                            # (TN, K, D) f32
    if emit_attn:
        attn_refs[0][0] = attn.reshape(tn, k * d).astype(attn_refs[0].dtype)

    # ---- weighted aggregation + linear2 + residual (f32 accumulation) ----
    vp = (vg.astype(jnp.float32) + pos).reshape(tn, k, d)
    agg = jnp.sum(attn * vp, axis=1)                           # (TN, D) f32
    out = jnp.dot(agg.astype(cdt), w2, preferred_element_type=jnp.float32) + b2
    out_ref[0] = out + feat_ref[0]


def _attend(q, kv_flat, rel_flat, features, p, tile_n, matmul_dtype,
            attn_dtype, return_attention, vmem_limit):
    B, N, Cin = features.shape
    D = q.shape[-1]
    K = kv_flat.shape[1] // N
    tnk = tile_n * K
    cdt = matmul_dtype

    w_spec = lambda shape: pl.BlockSpec(shape, lambda b, n: (0, 0))
    t3 = lambda rows, cols: pl.BlockSpec((1, rows, cols), lambda b, n: (b, n, 0))

    in_specs = [
        t3(tile_n, D),                 # q
        t3(tnk, 2 * D),                # gathered [keys | values], flat over N*K
        t3(tnk, 3),                    # relative coordinates (f32), flat
        t3(tile_n, Cin),               # residual features (f32)
        w_spec((3, D)), w_spec((1, D)),
        w_spec((D, D)), w_spec((1, D)),
        w_spec((D, D)), w_spec((1, D)),
        w_spec((D, D)), w_spec((1, D)),
        w_spec((D, Cin)), w_spec((1, Cin)),
    ]
    if return_attention:
        out_specs = [t3(tile_n, Cin), t3(tile_n, K * D)]
        out_shape = (jax.ShapeDtypeStruct((B, N, Cin), jnp.float32),
                     jax.ShapeDtypeStruct((B, N, K * D), attn_dtype))
    else:
        out_specs = t3(tile_n, Cin)
        out_shape = jax.ShapeDtypeStruct((B, N, Cin), jnp.float32)

    isz = jnp.dtype(cdt).itemsize
    asz = jnp.dtype(attn_dtype).itemsize if return_attention else 0
    per_point = 2 * (K * 3 * D + 3 * K * D * D + D * D + D * Cin) + 4 * K * D
    ce = pl.CostEstimate(
        flops=B * N * per_point,
        transcendentals=B * N * K * D,
        bytes_accessed=(B * N * (D + K * 2 * D) * isz
                        + B * N * K * 3 * 4 + 2 * B * N * Cin * 4
                        + B * N * K * D * asz
                        + (3 * D * D + D * Cin) * isz
                        + (3 * D + 4 * D + Cin) * 4))

    res = pl.pallas_call(
        functools.partial(_attn_kernel, return_attention),
        grid=(B, N // tile_n),
        in_specs=in_specs,
        out_specs=out_specs,
        out_shape=out_shape,
        compiler_params=pltpu.CompilerParams(
            dimension_semantics=("parallel", "parallel"),
            vmem_limit_bytes=vmem_limit),
        cost_estimate=ce,
    )(q, kv_flat, rel_flat, features,
      p["wp1"], p["bp1"], p["wp2"].astype(cdt), p["bp2"],
      p["wm1"].astype(cdt), p["bm1"], p["wm2"].astype(cdt), p["bm2"],
      p["w2"].astype(cdt), p["b2"])
    if return_attention:
        return res[0], res[1]
    return res, None


# --------------------------------------------------------------------------
# Glue: kNN selection (top_k) and data-dependent gathers stay in plain JAX.
# --------------------------------------------------------------------------
def _knn_indices(coordinates, k):
    # ||a-b||^2 = ||a||^2 + ||b||^2 - 2 a.b : matmul form runs the N^2 work on
    # the MXU and avoids the (B, N, N, 3) broadcast intermediate.
    # TODO(synk): for large N, tile this pre-pass (blockwise distances +
    # running top-k); the N^2 distance matrix is the next bottleneck.
    sq = jnp.sum(coordinates * coordinates, axis=-1)
    dots = jnp.einsum("bnd,bmd->bnm", coordinates, coordinates)
    dists = sq[:, :, None] + sq[:, None, :] - 2.0 * dots
    _, idx = jax.lax.top_k(-dists, k)        # k smallest distances, ascending
    return idx                               # (B, N, K) int32


def gather_points_flat(points, idx):
    """points: (B, N, C), idx: (B, N, K) -> (B, N*K, C) (row gather, kept flat)."""
    B, N, K = idx.shape
    flat = idx.reshape(B, N * K)
    return jnp.take_along_axis(points, flat[:, :, None], axis=1)


def point_transformer_forward(coordinates, features, params, k,
                              tile_n=None, matmul_dtype=jnp.float32,
                              attn_dtype=jnp.float32, return_attention=True):
    B, N, Cin = features.shape
    D = params["wq"].shape[0]
    cdt = matmul_dtype
    vmem_limit = _vmem_limit_bytes()
    if tile_n is None:
        tile_n = _choose_tile_n(N, k, D, Cin, jnp.dtype(cdt).itemsize,
                                jnp.dtype(attn_dtype).itemsize,
                                return_attention, vmem_limit, B)
    assert N % tile_n == 0 and (tile_n % 8 == 0 or tile_n == N)

    # kNN selection + the K-neighbor row gather are data-dependent indexing and
    # stay in XLA.  In bf16 mode the qkv slab (and hence the gathered [K|V]
    # slab — the dominant HBM stream) is materialized in bf16, halving it.
    # TODO(synk): move the [K|V] row gather inside the attention kernel (keep
    # the per-batch (N, 2D) slab resident in VMEM, gather per tile); Mosaic has
    # no general in-kernel dynamic row-gather today and a one-hot-matmul gather
    # would add O(N) MXU work per gathered row.
    knn_idx = _knn_indices(coordinates, k)
    knn_coords_flat = gather_points_flat(coordinates, knn_idx)        # (B, N*K, 3)
    rel_flat = jnp.repeat(coordinates, k, axis=1) - knn_coords_flat   # f32

    # Fold linear1 into Q/K/V: one matmul, one lane-dense (3D-wide) output.
    wcat = jnp.concatenate([params["wq"], params["wk"], params["wv"]], axis=1)
    wqkv = (params["w1"] @ wcat).astype(cdt)                          # (Cin, 3D)
    bqkv = params["b1"] @ wcat                                        # (1, 3D) f32
    qkv = _project_qkv(features.astype(cdt), wqkv, bqkv, tile_n, vmem_limit)

    q = qkv[..., :D]                                                  # (B, N, D)
    kv_flat = gather_points_flat(qkv[..., D:], knn_idx)               # (B, N*K, 2D)

    out, attn_flat = _attend(q, kv_flat, rel_flat, features, params, tile_n,
                             cdt, attn_dtype, return_attention, vmem_limit)
    if return_attention:
        return out, attn_flat.reshape(B, N, k, D)
    return out, None


# --------------------------------------------------------------------------
# Deterministic parameter init (PyTorch Linear-style uniform bounds).
# Weights are stored pre-transposed as (fan_in, fan_out): y = x @ W + b.
# --------------------------------------------------------------------------
def _init_linear(key, fan_in, fan_out, bias=True):
    kw, kb = jax.random.split(key)
    bound = 1.0 / math.sqrt(fan_in)
    w = jax.random.uniform(kw, (fan_in, fan_out), jnp.float32, -bound, bound)
    b = (jax.random.uniform(kb, (1, fan_out), jnp.float32, -bound, bound)
         if bias else None)
    return w, b


def make_params(key, dim_in, dim_out):
    ks = jax.random.split(key, 8)
    p = {}
    p["w1"], p["b1"] = _init_linear(ks[0], dim_in, dim_out)
    p["w2"], p["b2"] = _init_linear(ks[1], dim_out, dim_in)
    p["wk"], _ = _init_linear(ks[2], dim_out, dim_out, bias=False)
    p["wq"], _ = _init_linear(ks[3], dim_out, dim_out, bias=False)
    p["wv"], _ = _init_linear(ks[4], dim_out, dim_out, bias=False)
    p["wm1"], p["bm1"] = _init_linear(ks[5], dim_out, dim_out)
    p["wm2"], p["bm2"] = _init_linear(ks[6], dim_out, dim_out)
    kp1, kp2 = jax.random.split(ks[7])
    p["wp1"], p["bp1"] = _init_linear(kp1, 3, dim_out)
    p["wp2"], p["bp2"] = _init_linear(kp2, dim_out, dim_out)
    return p


# --------------------------------------------------------------------------
# Pure-JAX reference (same kNN selection, module-faithful math).
# --------------------------------------------------------------------------
def reference_forward(coordinates, features, p, k):
    B, N, _ = coordinates.shape
    knn_idx = _knn_indices(coordinates, k)
    gather4 = lambda pts: gather_points_flat(pts, knn_idx).reshape(B, N, k, -1)
    knn_coords = gather4(coordinates)
    x = features @ p["w1"] + p["b1"]
    q = x @ p["wq"]
    kf = gather4(x @ p["wk"])
    vf = gather4(x @ p["wv"])
    rel = coordinates[:, :, None, :] - knn_coords
    pos = jnp.maximum(rel @ p["wp1"] + p["bp1"], 0.0) @ p["wp2"] + p["bp2"]
    a = (jnp.maximum((q[:, :, None] - kf + pos) @ p["wm1"] + p["bm1"], 0.0)
         @ p["wm2"] + p["bm2"])
    a = jax.nn.softmax(a / math.sqrt(kf.shape[-1]), axis=-2)
    out = jnp.einsum("bmnf,bmnf->bmf", a, vf + pos)
    out = out @ p["w2"] + p["b2"] + features
    return out, a


if __name__ == "__main__":
    B, N, DIM_IN, DIM_OUT, K = 2, 16, 8, 32, 4

    key = jax.random.PRNGKey(0)
    k_coord, k_feat, k_param = jax.random.split(key, 3)
    coordinates = jax.random.normal(k_coord, (B, N, 3), jnp.float32)
    features = jax.random.normal(k_feat, (B, N, DIM_IN), jnp.float32)
    params = make_params(k_param, DIM_IN, DIM_OUT)

    out_ref, attn_ref = reference_forward(coordinates, features, params, K)

    # f32 path; tile_n=8 exercises the (B, N/TN) grid and index maps.
    fwd = jax.jit(functools.partial(point_transformer_forward,
                                    params=params, k=K, tile_n=8))
    out, attn = fwd(coordinates, features)
    jax.block_until_ready((out, attn))
    assert out.shape == (B, N, DIM_IN) and attn.shape == (B, N, K, DIM_OUT)
    assert jnp.allclose(out, out_ref, atol=1e-2, rtol=1e-2)
    assert jnp.allclose(attn, attn_ref, atol=1e-2, rtol=1e-2)

    # bf16-MXU path (recommended on v6e/v7x): bf16 qkv projection + bf16
    # gathered [K|V] slab + bf16 attention-weights writeback; softmax,
    # aggregation and the residual stay f32.
    fwd_bf16 = jax.jit(functools.partial(point_transformer_forward,
                                         params=params, k=K, tile_n=N,
                                         matmul_dtype=jnp.bfloat16,
                                         attn_dtype=jnp.bfloat16))
    out_b, attn_b = fwd_bf16(coordinates, features)
    jax.block_until_ready((out_b, attn_b))
    assert jnp.allclose(out_b, out_ref, atol=5e-2, rtol=5e-2)
    assert jnp.allclose(attn_b.astype(jnp.float32), attn_ref,
                        atol=5e-2, rtol=5e-2)

    # Auto-tiled (generation-aware) path with the attention-weights writeback
    # skipped entirely (the usually-largest store stream).
    fwd_light = jax.jit(functools.partial(point_transformer_forward,
                                          params=params, k=K,
                                          return_attention=False))
    out_l, attn_none = fwd_light(coordinates, features)
    jax.block_until_ready(out_l)
    assert attn_none is None
    assert jnp.allclose(out_l, out_ref, atol=1e-2, rtol=1e-2)

    print("KERNEL_OK")
</pallas_src>

<mosaic_0001>
module attributes {stable_mosaic.version = 11 : i64} {
  func.func @_attn_kernel(%arg0: i32, %arg1: i32, %arg2: memref<1x8x32xf32, #tpu.memory_space<vmem>>, %arg3: memref<1x32x64xf32, #tpu.memory_space<vmem>>, %arg4: memref<1x32x3xf32, #tpu.memory_space<vmem>>, %arg5: memref<1x8x8xf32, #tpu.memory_space<vmem>>, %arg6: memref<3x32xf32, #tpu.memory_space<vmem>>, %arg7: memref<1x32xf32, #tpu.memory_space<vmem>>, %arg8: memref<32x32xf32, #tpu.memory_space<vmem>>, %arg9: memref<1x32xf32, #tpu.memory_space<vmem>>, %arg10: memref<32x32xf32, #tpu.memory_space<vmem>>, %arg11: memref<1x32xf32, #tpu.memory_space<vmem>>, %arg12: memref<32x32xf32, #tpu.memory_space<vmem>>, %arg13: memref<1x32xf32, #tpu.memory_space<vmem>>, %arg14: memref<32x8xf32, #tpu.memory_space<vmem>>, %arg15: memref<1x8xf32, #tpu.memory_space<vmem>>, %arg16: memref<1x8x8xf32, #tpu.memory_space<vmem>>, %arg17: memref<1x8x128xf32, #tpu.memory_space<vmem>>) attributes {dimension_semantics = [#tpu.dimension_semantics<parallel>, #tpu.dimension_semantics<parallel>], iteration_bounds = array<i64: 2, 2>, scalar_prefetch = 0 : i64, scratch_operands = 0 : i64, tpu.core_type = #tpu.core_type<tc>, window_params = [{transform_indices = @transform_0, window_bounds = array<i64: 1, 8, 32>}, {transform_indices = @transform_1, window_bounds = array<i64: 1, 32, 64>}, {transform_indices = @transform_2, window_bounds = array<i64: 1, 32, 3>}, {transform_indices = @transform_3, window_bounds = array<i64: 1, 8, 8>}, {pipeline_mode = #tpu.pipeline_mode<synchronous>, transform_indices = @transform_4, window_bounds = array<i64: 3, 32>}, {pipeline_mode = #tpu.pipeline_mode<synchronous>, transform_indices = @transform_5, window_bounds = array<i64: 1, 32>}, {pipeline_mode = #tpu.pipeline_mode<synchronous>, transform_indices = @transform_6, window_bounds = array<i64: 32, 32>}, {pipeline_mode = #tpu.pipeline_mode<synchronous>, transform_indices = @transform_7, window_bounds = array<i64: 1, 32>}, {pipeline_mode = #tpu.pipeline_mode<synchronous>, transform_indices = @transform_8, window_bounds = array<i64: 32, 32>}, {pipeline_mode = #tpu.pipeline_mode<synchronous>, transform_indices = @transform_9, window_bounds = array<i64: 1, 32>}, {pipeline_mode = #tpu.pipeline_mode<synchronous>, transform_indices = @transform_10, window_bounds = array<i64: 32, 32>}, {pipeline_mode = #tpu.pipeline_mode<synchronous>, transform_indices = @transform_11, window_bounds = array<i64: 1, 32>}, {pipeline_mode = #tpu.pipeline_mode<synchronous>, transform_indices = @transform_12, window_bounds = array<i64: 32, 8>}, {pipeline_mode = #tpu.pipeline_mode<synchronous>, transform_indices = @transform_13, window_bounds = array<i64: 1, 8>}, {transform_indices = @transform_14, window_bounds = array<i64: 1, 8, 8>}, {transform_indices = @transform_15, window_bounds = array<i64: 1, 8, 128>}]} {
    %c0 = arith.constant 0 : index
    %c0_0 = arith.constant 0 : index
    %0 = vector.load %arg6[%c0, %c0_0] : memref<3x32xf32, #tpu.memory_space<vmem>>, vector<3x32xf32>
    %c0_1 = arith.constant 0 : index
    %c0_2 = arith.constant 0 : index
    %1 = vector.load %arg7[%c0_1, %c0_2] : memref<1x32xf32, #tpu.memory_space<vmem>>, vector<1x32xf32>
    %c0_3 = arith.constant 0 : index
    %c0_4 = arith.constant 0 : index
    %2 = vector.load %arg8[%c0_3, %c0_4] : memref<32x32xf32, #tpu.memory_space<vmem>>, vector<32x32xf32>
    %c0_5 = arith.constant 0 : index
    %c0_6 = arith.constant 0 : index
    %3 = vector.load %arg9[%c0_5, %c0_6] : memref<1x32xf32, #tpu.memory_space<vmem>>, vector<1x32xf32>
    %c0_7 = arith.constant 0 : index
    %c0_8 = arith.constant 0 : index
    %4 = vector.load %arg10[%c0_7, %c0_8] : memref<32x32xf32, #tpu.memory_space<vmem>>, vector<32x32xf32>
    %c0_9 = arith.constant 0 : index
    %c0_10 = arith.constant 0 : index
    %5 = vector.load %arg11[%c0_9, %c0_10] : memref<1x32xf32, #tpu.memory_space<vmem>>, vector<1x32xf32>
    %c0_11 = arith.constant 0 : index
    %c0_12 = arith.constant 0 : index
    %6 = vector.load %arg12[%c0_11, %c0_12] : memref<32x32xf32, #tpu.memory_space<vmem>>, vector<32x32xf32>
    %c0_13 = arith.constant 0 : index
    %c0_14 = arith.constant 0 : index
    %7 = vector.load %arg13[%c0_13, %c0_14] : memref<1x32xf32, #tpu.memory_space<vmem>>, vector<1x32xf32>
    %c0_15 = arith.constant 0 : index
    %c0_16 = arith.constant 0 : index
    %8 = vector.load %arg14[%c0_15, %c0_16] : memref<32x8xf32, #tpu.memory_space<vmem>>, vector<32x8xf32>
    %c0_17 = arith.constant 0 : index
    %c0_18 = arith.constant 0 : index
    %9 = vector.load %arg15[%c0_17, %c0_18] : memref<1x8xf32, #tpu.memory_space<vmem>>, vector<1x8xf32>
    %c0_19 = arith.constant 0 : index
    %c0_20 = arith.constant 0 : index
    %c0_21 = arith.constant 0 : index
    %10 = vector.load %arg4[%c0_19, %c0_20, %c0_21] : memref<1x32x3xf32, #tpu.memory_space<vmem>>, vector<1x32x3xf32>
    %11 = vector.shape_cast %10 : vector<1x32x3xf32> to vector<32x3xf32>
    %12 = vector.extract_strided_slice %11 {offsets = [0, 0], sizes = [32, 1], strides = [1, 1]} : vector<32x3xf32> to vector<32x1xf32>
    %13 = vector.extract_strided_slice %0 {offsets = [0, 0], sizes = [1, 32], strides = [1, 1]} : vector<3x32xf32> to vector<1x32xf32>
    %14 = vector.broadcast %12 : vector<32x1xf32> to vector<32x32xf32>
    %15 = vector.broadcast %13 : vector<1x32xf32> to vector<32x32xf32>
    %16 = arith.mulf %14, %15 : vector<32x32xf32>
    %17 = vector.extract_strided_slice %11 {offsets = [0, 1], sizes = [32, 1], strides = [1, 1]} : vector<32x3xf32> to vector<32x1xf32>
    %18 = vector.extract_strided_slice %0 {offsets = [1, 0], sizes = [1, 32], strides = [1, 1]} : vector<3x32xf32> to vector<1x32xf32>
    %19 = vector.broadcast %17 : vector<32x1xf32> to vector<32x32xf32>
    %20 = vector.broadcast %18 : vector<1x32xf32> to vector<32x32xf32>
    %21 = arith.mulf %19, %20 : vector<32x32xf32>
    %22 = arith.addf %16, %21 : vector<32x32xf32>
    %23 = vector.extract_strided_slice %11 {offsets = [0, 2], sizes = [32, 1], strides = [1, 1]} : vector<32x3xf32> to vector<32x1xf32>
    %24 = vector.extract_strided_slice %0 {offsets = [2, 0], sizes = [1, 32], strides = [1, 1]} : vector<3x32xf32> to vector<1x32xf32>
    %25 = vector.broadcast %23 : vector<32x1xf32> to vector<32x32xf32>
    %26 = vector.broadcast %24 : vector<1x32xf32> to vector<32x32xf32>
    %27 = arith.mulf %25, %26 : vector<32x32xf32>
    %28 = arith.addf %22, %27 : vector<32x32xf32>
    %29 = vector.broadcast %1 : vector<1x32xf32> to vector<32x32xf32>
    %30 = arith.addf %28, %29 : vector<32x32xf32>
    %cst = arith.constant 0.000000e+00 : f32
    %31 = vector.broadcast %cst : f32 to vector<32x32xf32>
    %32 = arith.maximumf %30, %31 : vector<32x32xf32>
    %cst_22 = arith.constant dense<0.000000e+00> : vector<32x32xf32>
    %33 = tpu.matmul %32, %2, %cst_22 {dimension_numbers = #tpu.dot_dimension_numbers<[1], [0], [0], [1], [0, 0, 1, 1], [], []>} : vector<32x32xf32>, vector<32x32xf32>, vector<32x32xf32> -> vector<32x32xf32>
    %34 = vector.broadcast %3 : vector<1x32xf32> to vector<32x32xf32>
    %35 = arith.addf %33, %34 : vector<32x32xf32>
    %c0_23 = arith.constant 0 : index
    %c0_24 = arith.constant 0 : index
    %c0_25 = arith.constant 0 : index
    %36 = vector.load %arg3[%c0_23, %c0_24, %c0_25] : memref<1x32x64xf32, #tpu.memory_space<vmem>>, vector<1x32x64xf32>
    %37 = vector.shape_cast %36 : vector<1x32x64xf32> to vector<32x64xf32>
    %38 = vector.extract_strided_slice %37 {offsets = [0, 0], sizes = [32, 32], strides = [1, 1]} : vector<32x64xf32> to vector<32x32xf32>
    %39 = vector.extract_strided_slice %37 {offsets = [0, 32], sizes = [32, 32], strides = [1, 1]} : vector<32x64xf32> to vector<32x32xf32>
    %c0_26 = arith.constant 0 : index
    %c0_27 = arith.constant 0 : index
    %c0_28 = arith.constant 0 : index
    %40 = vector.load %arg2[%c0_26, %c0_27, %c0_28] : memref<1x8x32xf32, #tpu.memory_space<vmem>>, vector<1x8x32xf32>
    %41 = vector.shape_cast %40 : vector<1x8x32xf32> to vector<8x32xf32>
    %cst_29 = arith.constant dense<0.000000e+00> : vector<8x32xf32>
    %42 = tpu.matmul %41, %4, %cst_29 {dimension_numbers = #tpu.dot_dimension_numbers<[1], [0], [0], [1], [0, 0, 1, 1], [], []>} : vector<8x32xf32>, vector<32x32xf32>, vector<8x32xf32> -> vector<8x32xf32>
    %43 = vector.broadcast %5 : vector<1x32xf32> to vector<8x32xf32>
    %44 = arith.addf %42, %43 : vector<8x32xf32>
    %45 = arith.subf %35, %38 : vector<32x32xf32>
    %cst_30 = arith.constant dense<0.000000e+00> : vector<32x32xf32>
    %46 = tpu.matmul %45, %4, %cst_30 {dimension_numbers = #tpu.dot_dimension_numbers<[1], [0], [0], [1], [0, 0, 1, 1], [], []>} : vector<32x32xf32>, vector<32x32xf32>, vector<32x32xf32> -> vector<32x32xf32>
    %47 = vector.shape_cast %46 : vector<32x32xf32> to vector<8x4x32xf32>
    %48 = vector.shape_cast %44 : vector<8x32xf32> to vector<8x1x32xf32>
    %49 = vector.broadcast %48 : vector<8x1x32xf32> to vector<8x4x32xf32>
    %50 = arith.addf %47, %49 : vector<8x4x32xf32>
    %cst_31 = arith.constant 0.000000e+00 : f32
    %51 = vector.broadcast %cst_31 : f32 to vector<8x4x32xf32>
    %52 = arith.maximumf %50, %51 : vector<8x4x32xf32>
    %53 = vector.shape_cast %52 : vector<8x4x32xf32> to vector<32x32xf32>
    %cst_32 = arith.constant dense<0.000000e+00> : vector<32x32xf32>
    %54 = tpu.matmul %53, %6, %cst_32 {dimension_numbers = #tpu.dot_dimension_numbers<[1], [0], [0], [1], [0, 0, 1, 1], [], []>} : vector<32x32xf32>, vector<32x32xf32>, vector<32x32xf32> -> vector<32x32xf32>
    %55 = vector.broadcast %7 : vector<1x32xf32> to vector<32x32xf32>
    %56 = arith.addf %54, %55 : vector<32x32xf32>
    %57 = vector.shape_cast %56 : vector<32x32xf32> to vector<8x4x32xf32>
    %cst_33 = arith.constant 0.176776692 : f32
    %58 = vector.broadcast %cst_33 : f32 to vector<8x4x32xf32>
    %59 = arith.mulf %57, %58 : vector<8x4x32xf32>
    %cst_34 = arith.constant dense<0xFF800000> : vector<8x32xf32>
    %60 = vector.multi_reduction <maximumf>, %59, %cst_34 [1] : vector<8x4x32xf32> to vector<8x32xf32>
    %61 = vector.shape_cast %60 : vector<8x32xf32> to vector<8x1x32xf32>
    %62 = vector.broadcast %61 : vector<8x1x32xf32> to vector<8x4x32xf32>
    %63 = arith.subf %59, %62 : vector<8x4x32xf32>
    %64 = math.exp %63 : vector<8x4x32xf32>
    %cst_35 = arith.constant dense<0.000000e+00> : vector<8x32xf32>
    %65 = vector.multi_reduction <add>, %64, %cst_35 [1] : vector<8x4x32xf32> to vector<8x32xf32>
    %66 = vector.shape_cast %65 : vector<8x32xf32> to vector<8x1x32xf32>
    %67 = tpu.reciprocal %66 {approx = true} : vector<8x1x32xf32> -> vector<8x1x32xf32>
    %68 = vector.broadcast %67 : vector<8x1x32xf32> to vector<8x4x32xf32>
    %69 = arith.mulf %64, %68 : vector<8x4x32xf32>
    %70 = vector.shape_cast %69 : vector<8x4x32xf32> to vector<8x128xf32>
    %c0_36 = arith.constant 0 : index
    %c0_37 = arith.constant 0 : index
    %c0_38 = arith.constant 0 : index
    %71 = vector.load %arg17[%c0_36, %c0_37, %c0_38] : memref<1x8x128xf32, #tpu.memory_space<vmem>>, vector<1x8x128xf32>
    %72 = vector.shape_cast %71 : vector<1x8x128xf32> to vector<8x128xf32>
    %73 = vector.shape_cast %70 : vector<8x128xf32> to vector<1x8x128xf32>
    tpu.vector_store %arg17[%c0_36, %c0_37, %c0_38], %73 {strides = array<i32>} : memref<1x8x128xf32, #tpu.memory_space<vmem>>, vector<1x8x128xf32>,
    %74 = arith.addf %39, %35 : vector<32x32xf32>
    %75 = vector.shape_cast %74 : vector<32x32xf32> to vector<8x4x32xf32>
    %76 = arith.mulf %69, %75 : vector<8x4x32xf32>
    %cst_39 = arith.constant dense<0.000000e+00> : vector<8x32xf32>
    %77 = vector.multi_reduction <add>, %76, %cst_39 [1] : vector<8x4x32xf32> to vector<8x32xf32>
    %cst_40 = arith.constant dense<0.000000e+00> : vector<8x8xf32>
    %78 = tpu.matmul %77, %8, %cst_40 {dimension_numbers = #tpu.dot_dimension_numbers<[1], [0], [0], [1], [0, 0, 1, 1], [], []>} : vector<8x32xf32>, vector<32x8xf32>, vector<8x8xf32> -> vector<8x8xf32>
    %79 = vector.broadcast %9 : vector<1x8xf32> to vector<8x8xf32>
    %80 = arith.addf %78, %79 : vector<8x8xf32>
    %c0_41 = arith.constant 0 : index
    %c0_42 = arith.constant 0 : index
    %c0_43 = arith.constant 0 : index
    %81 = vector.load %arg5[%c0_41, %c0_42, %c0_43] : memref<1x8x8xf32, #tpu.memory_space<vmem>>, vector<1x8x8xf32>
    %82 = vector.shape_cast %81 : vector<1x8x8xf32> to vector<8x8xf32>
    %83 = arith.addf %80, %82 : vector<8x8xf32>
    %c0_44 = arith.constant 0 : index
    %c0_45 = arith.constant 0 : index
    %c0_46 = arith.constant 0 : index
    %84 = vector.load %arg16[%c0_44, %c0_45, %c0_46] : memref<1x8x8xf32, #tpu.memory_space<vmem>>, vector<1x8x8xf32>
    %85 = vector.shape_cast %84 : vector<1x8x8xf32> to vector<8x8xf32>
    %86 = vector.shape_cast %83 : vector<8x8xf32> to vector<1x8x8xf32>
    tpu.vector_store %arg16[%c0_44, %c0_45, %c0_46], %86 {strides = array<i32>} : memref<1x8x8xf32, #tpu.memory_space<vmem>>, vector<1x8x8xf32>,
    return
  }
  func.func @transform_0(%arg0: i32, %arg1: i32) -> (i32, i32, i32) {
    %c0_i32 = arith.constant 0 : i32
    %c0_i32_0 = arith.constant 0 : i32
    return %arg0, %arg1, %c0_i32 : i32, i32, i32
  }
  func.func @transform_1(%arg0: i32, %arg1: i32) -> (i32, i32, i32) {
    %c0_i32 = arith.constant 0 : i32
    %c0_i32_0 = arith.constant 0 : i32
    return %arg0, %arg1, %c0_i32 : i32, i32, i32
  }
  func.func @transform_2(%arg0: i32, %arg1: i32) -> (i32, i32, i32) {
    %c0_i32 = arith.constant 0 : i32
    %c0_i32_0 = arith.constant 0 : i32
    return %arg0, %arg1, %c0_i32 : i32, i32, i32
  }
  func.func @transform_3(%arg0: i32, %arg1: i32) -> (i32, i32, i32) {
    %c0_i32 = arith.constant 0 : i32
    %c0_i32_0 = arith.constant 0 : i32
    return %arg0, %arg1, %c0_i32 : i32, i32, i32
  }
  func.func @transform_4(%arg0: i32, %arg1: i32) -> (i32, i32) {
    %c0_i32 = arith.constant 0 : i32
    %c0_i32_0 = arith.constant 0 : i32
    %c0_i32_1 = arith.constant 0 : i32
    return %c0_i32, %c0_i32_0 : i32, i32
  }
  func.func @transform_5(%arg0: i32, %arg1: i32) -> (i32, i32) {
    %c0_i32 = arith.constant 0 : i32
    %c0_i32_0 = arith.constant 0 : i32
    %c0_i32_1 = arith.constant 0 : i32
    return %c0_i32, %c0_i32_0 : i32, i32
  }
  func.func @transform_6(%arg0: i32, %arg1: i32) -> (i32, i32) {
    %c0_i32 = arith.constant 0 : i32
    %c0_i32_0 = arith.constant 0 : i32
    %c0_i32_1 = arith.constant 0 : i32
    return %c0_i32, %c0_i32_0 : i32, i32
  }
  func.func @transform_7(%arg0: i32, %arg1: i32) -> (i32, i32) {
    %c0_i32 = arith.constant 0 : i32
    %c0_i32_0 = arith.constant 0 : i32
    %c0_i32_1 = arith.constant 0 : i32
    return %c0_i32, %c0_i32_0 : i32, i32
  }
  func.func @transform_8(%arg0: i32, %arg1: i32) -> (i32, i32) {
    %c0_i32 = arith.constant 0 : i32
    %c0_i32_0 = arith.constant 0 : i32
    %c0_i32_1 = arith.constant 0 : i32
    return %c0_i32, %c0_i32_0 : i32, i32
  }
  func.func @transform_9(%arg0: i32, %arg1: i32) -> (i32, i32) {
    %c0_i32 = arith.constant 0 : i32
    %c0_i32_0 = arith.constant 0 : i32
    %c0_i32_1 = arith.constant 0 : i32
    return %c0_i32, %c0_i32_0 : i32, i32
  }
  func.func @transform_10(%arg0: i32, %arg1: i32) -> (i32, i32) {
    %c0_i32 = arith.constant 0 : i32
    %c0_i32_0 = arith.constant 0 : i32
    %c0_i32_1 = arith.constant 0 : i32
    return %c0_i32, %c0_i32_0 : i32, i32
  }
  func.func @transform_11(%arg0: i32, %arg1: i32) -> (i32, i32) {
    %c0_i32 = arith.constant 0 : i32
    %c0_i32_0 = arith.constant 0 : i32
    %c0_i32_1 = arith.constant 0 : i32
    return %c0_i32, %c0_i32_0 : i32, i32
  }
  func.func @transform_12(%arg0: i32, %arg1: i32) -> (i32, i32) {
    %c0_i32 = arith.constant 0 : i32
    %c0_i32_0 = arith.constant 0 : i32
    %c0_i32_1 = arith.constant 0 : i32
    return %c0_i32, %c0_i32_0 : i32, i32
  }
  func.func @transform_13(%arg0: i32, %arg1: i32) -> (i32, i32) {
    %c0_i32 = arith.constant 0 : i32
    %c0_i32_0 = arith.constant 0 : i32
    %c0_i32_1 = arith.constant 0 : i32
    return %c0_i32, %c0_i32_0 : i32, i32
  }
  func.func @transform_14(%arg0: i32, %arg1: i32) -> (i32, i32, i32) {
    %c0_i32 = arith.constant 0 : i32
    %c0_i32_0 = arith.constant 0 : i32
    return %arg0, %arg1, %c0_i32 : i32, i32, i32
  }
  func.func @transform_15(%arg0: i32, %arg1: i32) -> (i32, i32, i32) {
    %c0_i32 = arith.constant 0 : i32
    %c0_i32_0 = arith.constant 0 : i32
    return %arg0, %arg1, %c0_i32 : i32, i32, i32
  }
}

module attributes {stable_mosaic.version = 11 : i64} {
  func.func @_qkv_kernel(%arg0: i32, %arg1: i32, %arg2: memref<1x8x8xf32, #tpu.memory_space<vmem>>, %arg3: memref<8x96xf32, #tpu.memory_space<vmem>>, %arg4: memref<1x96xf32, #tpu.memory_space<vmem>>, %arg5: memref<1x8x96xf32, #tpu.memory_space<vmem>>) attributes {dimension_semantics = [#tpu.dimension_semantics<parallel>, #tpu.dimension_semantics<parallel>], iteration_bounds = array<i64: 2, 2>, scalar_prefetch = 0 : i64, scratch_operands = 0 : i64, tpu.core_type = #tpu.core_type<tc>, window_params = [{transform_indices = @transform_0, window_bounds = array<i64: 1, 8, 8>}, {pipeline_mode = #tpu.pipeline_mode<synchronous>, transform_indices = @transform_1, window_bounds = array<i64: 8, 96>}, {pipeline_mode = #tpu.pipeline_mode<synchronous>, transform_indices = @transform_2, window_bounds = array<i64: 1, 96>}, {transform_indices = @transform_3, window_bounds = array<i64: 1, 8, 96>}]} {
    %c0 = arith.constant 0 : index
    %c0_0 = arith.constant 0 : index
    %c0_1 = arith.constant 0 : index
    %0 = vector.load %arg2[%c0, %c0_0, %c0_1] : memref<1x8x8xf32, #tpu.memory_space<vmem>>, vector<1x8x8xf32>
    %1 = vector.shape_cast %0 : vector<1x8x8xf32> to vector<8x8xf32>
    %c0_2 = arith.constant 0 : index
    %c0_3 = arith.constant 0 : index
    %2 = vector.load %arg3[%c0_2, %c0_3] : memref<8x96xf32, #tpu.memory_space<vmem>>, vector<8x96xf32>
    %cst = arith.constant dense<0.000000e+00> : vector<8x96xf32>
    %3 = tpu.matmul %1, %2, %cst {dimension_numbers = #tpu.dot_dimension_numbers<[1], [0], [0], [1], [0, 0, 1, 1], [], []>} : vector<8x8xf32>, vector<8x96xf32>, vector<8x96xf32> -> vector<8x96xf32>
    %c0_4 = arith.constant 0 : index
    %c0_5 = arith.constant 0 : index
    %4 = vector.load %arg4[%c0_4, %c0_5] : memref<1x96xf32, #tpu.memory_space<vmem>>, vector<1x96xf32>
    %5 = vector.broadcast %4 : vector<1x96xf32> to vector<8x96xf32>
    %6 = arith.addf %3, %5 : vector<8x96xf32>
    %c0_6 = arith.constant 0 : index
    %c0_7 = arith.constant 0 : index
    %c0_8 = arith.constant 0 : index
    %7 = vector.load %arg5[%c0_6, %c0_7, %c0_8] : memref<1x8x96xf32, #tpu.memory_space<vmem>>, vector<1x8x96xf32>
    %8 = vector.shape_cast %7 : vector<1x8x96xf32> to vector<8x96xf32>
    %9 = vector.shape_cast %6 : vector<8x96xf32> to vector<1x8x96xf32>
    tpu.vector_store %arg5[%c0_6, %c0_7, %c0_8], %9 {strides = array<i32>} : memref<1x8x96xf32, #tpu.memory_space<vmem>>, vector<1x8x96xf32>,
    return
  }
  func.func @transform_0(%arg0: i32, %arg1: i32) -> (i32, i32, i32) {
    %c0_i32 = arith.constant 0 : i32
    %c0_i32_0 = arith.constant 0 : i32
    return %arg0, %arg1, %c0_i32 : i32, i32, i32
  }
  func.func @transform_1(%arg0: i32, %arg1: i32) -> (i32, i32) {
    %c0_i32 = arith.constant 0 : i32
    %c0_i32_0 = arith.constant 0 : i32
    %c0_i32_1 = arith.constant 0 : i32
    return %c0_i32, %c0_i32_0 : i32, i32
  }
  func.func @transform_2(%arg0: i32, %arg1: i32) -> (i32, i32) {
    %c0_i32 = arith.constant 0 : i32
    %c0_i32_0 = arith.constant 0 : i32
    %c0_i32_1 = arith.constant 0 : i32
    return %c0_i32, %c0_i32_0 : i32, i32
  }
  func.func @transform_3(%arg0: i32, %arg1: i32) -> (i32, i32, i32) {
    %c0_i32 = arith.constant 0 : i32
    %c0_i32_0 = arith.constant 0 : i32
    return %arg0, %arg1, %c0_i32 : i32, i32, i32
  }
}

</mosaic_0001>

<bundles_post_ra>
// kernel: point_transformer_forward.2
= control target key start
LH: loop header
LB: loop body
LE: loop exit
PB: predicated region body
PF: predicated region fallthrough
CT: control target
= control target key end

     0   :  { %s497_s12 = smov 0   ;;  %s499_s13 = smov 0   ;;  %s554_s0 = inlined_call_operand.vmem [shape: f32[2,16,8], index: 0, kind: input, shape index: {}]   ;;  %s555_s1 = inlined_call_operand.vmem [shape: f32[8,96], index: 1, kind: input, shape index: {}]   ;;  %s556_s2 = inlined_call_operand.vmem [shape: f32[1,96], index: 2, kind: input, shape index: {}]   ;;  %s557_s3 = inlined_call_operand.vmem [shape: f32[2,16,96], index: 3, kind: output, shape index: {}]  }
   0x1   :  { %s501_s14 = smov 0   ;;  %s503_s15 = smov 0  }
   0x2   :  { %s505_s16 = smov 0  }
   0x3 LB: > { %s22_s17 = sadd.s32 1, %s465_s14  ;;  %s25_s18 = sadd.s32 1, %s469_s15  ;;  %s473_s16 = sphi %s505_s16, %s13_s16   ;;  %s469_s15 = sphi %s503_s15, %s561_s15   ;;  %s465_s14 = sphi %s501_s14, %s560_s14   ;;  %s461_s13 = sphi %s499_s13, %s559_s13   ;;  %s457_s12 = sphi %s497_s12, %s558_s12  }
   0x4   : > { %p23_p0 = scmp.ge.s32.totalorder %s22_s17, 2  ;;  %p377_p1 = scmp.ge.s32.totalorder %s473_s16, 1 }
   0x5   : > { %p156_p2 = scmp.lt.s32.totalorder %s473_s16, 5 }
   0x6   : > { %s563_s17 = smov (%p23_p0, %s22_s17), 0  ;;  %s565_s18 = smov (!%p23_p0, %s25_s18), %s469_s15 }
   0x7   : > { %p157_p3 = pnand %p377_p1, %p156_p2  ;;  %p27_p4 = scmp.ge.s32.totalorder %s565_s18, 2 }
   0x8   : > { %v203_v0 = vld [vmem:[%s555_s1] sm:$0xff] (!%p157_p3)  ;;  %p186_p5 = scmp.lt.s32.totalorder (!%p157_p3), %s461_s13, 1  ;;  %p188_p6 = scmp.lt.s32.totalorder (!%p157_p3), %s457_s12, 1  ;;  %v475_v1 = vmov (!%p157_p3), 0.0   ;;  %vm476_vm0 = vmmov (!%p157_p3), 0   ;;  %vm211_vm1 = vcmask (!%p157_p3), 64512  }
   0x9   : > { %s567_s18 = smov (%p27_p4, %s565_s18), 0  ;;  %160 = sbr.rel (%p157_p3) target bundleno = 237 (0xed), region = 32 }
   0xa   : > { %388 = vmatprep.subr.mxu0 (!%p157_p3), %v475_v1  ;;  %390 = vmatprep.mubr.msk.f32.mxu0 (!%p157_p3), %vm476_vm0, %v475_v1  ;;  %v382_v3 = vld [vmem:[%s556_s2] ss:$0 sm:$0xff] (!%p157_p3)  ;;  %vm285_vm2 = vcmask (!%p157_p3), 785408  }
   0xb   : > { %389 = vmatpush3.msra.mxu0 (!%p157_p3), %v203_v0 }
  0x10   : > { %s569_s13 = smov (!%p186_p5, %s461_s13), 1  ;;  %s571_s12 = smov (!%p188_p6, %s457_s12), 1 }
  0x11   : > { %s378_s21 = sshll.u32 %s569_s13, 1 }
  0x12   : > { %s191_s22 = sadd.s32 %s378_s21, %s571_s12 }
  0x13   : > { %s379_s23 = sshll.u32 %s191_s22, 3 }
  0x14   : > { %s193_s26 = scalar_lea.vmem %s554_s0, %s379_s23  ;;  %s201_s4 = scalar_lea.vmem %s557_s3, %s379_s23 }
  0x15   : > { %v202_v2 = vld [vmem:[%s193_s26] sm:$0xff] }
  0x16   : > { %391 = vmatmul.mubr.msk.f32.vlgmr.msra.gmra.mrb[0].mxu0 %vm211_vm1, %v202_v2 }
  0xe9   : > { %v281_v4 = vpop.f32.mrb[0].mxu0 }
  0xea   : > { %v282_v5 = vadd.f32 %v382_v3, %v281_v4  ;;  %v392_v6 = vpop.f32.mrb[1].mxu0 }
  0xec   : > { %286 = vst.msk [vmem:[%s201_s4] sm:$0xff] %vm285_vm2, %v282_v5 }
  0xed PF: > { %s13_s16 = sadd.s32 1, %s473_s16   ;;  %s558_s12 = smov %s465_s14 }
  0xee   : > { %p10_p7 = scmp.ge.s32.totalorder %s13_s16, 6   ;;  %s559_s13 = smov %s469_s15 }
  0xef   : > { %s560_s14 = smov %s563_s17  ;;  %s561_s15 = smov %s567_s18 }
  0xf0   :  { %12 = sbr.rel (!%p10_p7) target bundleno = 3 (0x3), region = 62 }

// kernel: point_transformer_forward.3
= control target key start
LH: loop header
LB: loop body
LE: loop exit
PB: predicated region body
PF: predicated region fallthrough
CT: control target
= control target key end

     0   :  { %s2370_s18 = smov 0   ;;  %s2372_s19 = smov 0   ;;  %s2657_s0 = inlined_call_operand.vmem [shape: f32[2,16,32], index: 0, kind: input, shape index: {}]   ;;  %s2658_s1 = inlined_call_operand.vmem [shape: f32[2,64,64], index: 1, kind: input, shape index: {}]   ;;  %s2659_s2 = inlined_call_operand.vmem [shape: f32[2,64,3], index: 2, kind: input, shape index: {}]   ;;  %s2660_s3 = inlined_call_operand.vmem [shape: f32[2,16,8], index: 3, kind: input, shape index: {}]   ;;  %s2661_s4 = inlined_call_operand.vmem [shape: f32[3,32], index: 4, kind: input, shape index: {}]   ;;  %s2662_s5 = inlined_call_operand.vmem [shape: f32[1,32], index: 5, kind: input, shape index: {}]   ;;  %s2663_s6 = inlined_call_operand.vmem [shape: f32[32,32], index: 6, kind: input, shape index: {}]   ;;  %s2664_s7 = inlined_call_operand.vmem [shape: f32[1,32], index: 7, kind: input, shape index: {}]   ;;  %s2665_s8 = inlined_call_operand.vmem [shape: f32[32,32], index: 8, kind: input, shape index: {}]   ;;  %s2666_s9 = inlined_call_operand.vmem [shape: f32[1,32], index: 9, kind: input, shape index: {}]   ;;  %s2667_s10 = inlined_call_operand.vmem [shape: f32[32,32], index: 10, kind: input, shape index: {}]   ;;  %s2668_s11 = inlined_call_operand.vmem [shape: f32[1,32], index: 11, kind: input, shape index: {}]   ;;  %s2669_s12 = inlined_call_operand.vmem [shape: f32[32,8], index: 12, kind: input, shape index: {}]   ;;  %s2670_s13 = inlined_call_operand.vmem [shape: f32[1,8], index: 13, kind: input, shape index: {}]   ;;  %s2671_s14 = inlined_call_operand.vmem [shape: f32[2,16,8], index: 14, kind: output, shape index: {0}]   ;;  %s2672_s15 = inlined_call_operand.vmem [shape: f32[2,16,128], index: 15, kind: output, shape index: {1}]  }
   0x1   :  { %2674 = sst [smem:[#allocation2_spill]] %s2659_s2  ;;  %s2374_s20 = smov 0  }
   0x2   :  { %s2376_s21 = smov 0   ;;  %s2378_s22 = smov 0  }
   0x3 LB: > { %s35_s23 = sadd.s32 1, %s2268_s20  ;;  %s38_s24 = sadd.s32 1, %s2272_s21  ;;  %s2276_s22 = sphi %s2378_s22, %s26_s22   ;;  %s2272_s21 = sphi %s2376_s21, %s2680_s21   ;;  %s2268_s20 = sphi %s2374_s20, %s2679_s20   ;;  %s2264_s19 = sphi %s2372_s19, %s2678_s19   ;;  %s2260_s18 = sphi %s2370_s18, %s2677_s18  }
   0x4   : > { %p36_p0 = scmp.ge.s32.totalorder %s35_s23, 2  ;;  %p1972_p1 = scmp.ge.s32.totalorder %s2276_s22, 1 }
   0x5   : > { %p510_p2 = scmp.lt.s32.totalorder %s2276_s22, 5 }
   0x6   : > { %s2682_s23 = smov (%p36_p0, %s35_s23), 0  ;;  %s2684_s24 = smov (!%p36_p0, %s38_s24), %s2272_s21 }
   0x7   : > { %p511_p3 = pnand %p1972_p1, %p510_p2  ;;  %p40_p4 = scmp.ge.s32.totalorder %s2684_s24, 2 }
   0x8   : > { %p598_p5 = scmp.lt.s32.totalorder (!%p511_p3), %s2264_s19, 1  ;;  %s1975_s25 = sshll.u32 (!%p511_p3), %s2260_s18, 2  ;;  %v2278_v0 = vmov (!%p511_p3), 0   ;;  %v2279_v3 = vmov (!%p511_p3), 1   ;;  %v2280_v5 = vmov (!%p511_p3), 2   ;;  %v652_v7 = vld [vmem:[%s2663_s6] sm:$0xff] (!%p511_p3)  ;;  %v696_v22 = vlaneseq (!%p511_p3) }
   0x9   : > { %s2686_s24 = smov (%p40_p4, %s2684_s24), 0  ;;  %514 = sbr.rel (%p511_p3) target bundleno = 1139 (0x473), region = 76 }
   0xa   : > { %2198 = vset.pattern.permute.xlu1 (!%p511_p3), %v2278_v0  ;;  %2196 = vset.pattern.permute.xlu0 (!%p511_p3), %v2278_v0  ;;  %p609_p6 = scmp.lt.s32.totalorder (!%p511_p3), %s1975_s25, 7  ;;  %s2675_s2 = sld [smem:[#allocation2_spill]] (!%p511_p3)  ;;  %v653_v8 = vld [vmem:[%s2663_s6 + $0x8] sm:$0xff] (!%p511_p3)  ;;  %v654_v10 = vld [vmem:[%s2663_s6 + $0x10] sm:$0xff] (!%p511_p3)  ;;  %v655_v11 = vld [vmem:[%s2663_s6 + $0x18] sm:$0xff] (!%p511_p3)  ;;  %v2281_v16 = vmov (!%p511_p3), 0.0|0.0  }
   0xb   : > { %v2108_v9 = vpack.c.bf16 (!%p511_p3), %v653_v8, %v652_v7  ;;  %v2112_v12 = vpack.c.bf16 (!%p511_p3), %v655_v11, %v654_v10  ;;  %v657_v13 = vld [vmem:[%s2665_s8] sm:$0xff] (!%p511_p3)  ;;  %v658_v14 = vld [vmem:[%s2665_s8 + $0x8] sm:$0xff] (!%p511_p3)  ;;  %v659_v15 = vld [vmem:[%s2665_s8 + $0x10] sm:$0xff] (!%p511_p3)  ;;  %2116 = vmatprep.subr.bf16.mxu1 (!%p511_p3), %v2281_v16  ;;  %vm2282_vm0 = vmmov (!%p511_p3), 0   ;;  %v2283_v19 = vmov (!%p511_p3), 0.0   ;;  %p600_p7 = scmp.lt.s32.totalorder (!%p511_p3), %s2260_s18, 1 }
   0xc   : > { %v2117_v17 = vpack.c.bf16 (!%p511_p3), %v658_v14, %v657_v13  ;;  %v660_v18 = vld [vmem:[%s2665_s8 + $0x18] sm:$0xff] (!%p511_p3)  ;;  %2066 = vmatprep.mubr.msk.f32.mxu1 (!%p511_p3), %vm2282_vm0, %v2283_v19  ;;  %vm780_vm1 = vcmask (!%p511_p3), 261120   ;;  %v2452_v23 = vshrl.u32 (!%p511_p3), %v696_v22, 7  ;;  %v650_v25 = vld [vmem:[%s2661_s4] sm:$0x7] (!%p511_p3)  ;;  %vm1312_vm2 = vcmask (!%p511_p3), 257024  }
   0xd   : > { %2109 = vmatprep.subr.bf16.mxu0 (!%p511_p3), %v2108_v9  ;;  %v2120_v20 = vpack.c.bf16 (!%p511_p3), %v660_v18, %v659_v15  ;;  %v1987_v42 = vld [vmem:[%s2662_s5] ss:$0 sm:$0xff] (!%p511_p3)  ;;  %vm1691_vm3 = vcmask (!%p511_p3), 1041409   ;;  %vm1693_vm4 = vcmask (!%p511_p3), 1042434   ;;  %vm1695_vm5 = vcmask (!%p511_p3), 1043459  }
   0xe   : > { %2111 = vmatpush3.bf16.msra.mxu0 (!%p511_p3), %v2108_v9  ;;  %2118 = vmatpush3.bf16.msra.mxu1 (!%p511_p3), %v2117_v17  ;;  %v2455_v24 = vsub.s32 (!%p511_p3), 0, %v2452_v23  ;;  %v722_v28 = vsub.s32 (!%p511_p3), 1, %v2452_v23  ;;  %v750_v30 = vsub.s32 (!%p511_p3), 2, %v2452_v23  ;;  %v1988_v8 = vld [vmem:[%s2664_s7] ss:$0 sm:$0xff] (!%p511_p3)  ;;  %vm1697_vm6 = vcmask (!%p511_p3), 1044484  }
   0xf   : > { %2113 = vmatprep.subr.bf16.mxu0 (!%p511_p3), %v2112_v12  ;;  %2119 = vmatprep.subr.bf16.mxu1 (!%p511_p3), %v2281_v16  ;;  %vm1699_vm7 = vcmask (!%p511_p3), 1045509   ;;  %vm1701_vm8 = vcmask (!%p511_p3), 1046534   ;;  %vm1703_vm9 = vcmask (!%p511_p3), 1047559   ;;  %vm1556_vm10 = vcmask (!%p511_p3), 523264  }
  0x10   : > { %s2688_s19 = smov (!%p598_p5, %s2264_s19), 1  ;;  %s2690_s25 = smov (!%p609_p6, %s1975_s25), 7  ;;  %v699_v29 = vrot.slane %v650_v25, %v2455_v24  ;;  %v723_v31 = vrot.slane %v650_v25, %v722_v28  ;;  %v751_v36 = vrot.slane %v650_v25, %v750_v30  ;;  %vm1558_vm11 = vcmask 785408  }
  0x11   : > { %s1976_s26 = sshll.u32 %s2688_s19, 3  ;;  %s1973_s17 = sshll.u32 %s2688_s19, 1  ;;  %vm1779_vm12 = vcmask 64512  }
  0x12   : > { %s2406_s27 = sadd.s32 %s1976_s26, %s2690_s25  ;;  %2115 = vmatpush3.bf16.msra.mxu0 %v2112_v12  ;;  %s2692_s18 = smov (!%p600_p7, %s2260_s18), 1  ;;  %2121 = vmatpush3.bf16.msra.mxu1 %v2120_v20 }
  0x13   : > { %s2673_s28 = sshll.u32 %s2406_s27, 3  ;;  %2123 = vmatprep.subr.bf16.mxu0 %v2117_v17  ;;  %s2285_s19 = smov 96  }
  0x14   : > { %s624_s16 = scalar_lea.vmem %s2675_s2, %s2673_s28  ;;  %s603_s28 = sadd.s32 %s1973_s17, %s2692_s18 }
  0x15   : > { %v673_v1 = vld [vmem:[%s624_s16 + $0x8] sm:$0xff]  ;;  %v672_v2 = vld [vmem:[%s624_s16] sm:$0xff]  ;;  %v675_v4 = vld [vmem:[%s624_s16 + $0x18] sm:$0xff]  ;;  %s2445_s25 = sshll.u32 %s603_s28, 3  ;;  %s2676_s17 = sshll.u32 %s2406_s27, 3 }
  0x16   : > { %683 = vperm.xlu1 %2198, %v673_v1   ;;  %678 = vperm.xlu0 %2196, %v672_v2   ;;  %v674_v6 = vld [vmem:[%s624_s16 + $0x10] sm:$0xff]  ;;  %s605_s29 = scalar_lea.vmem %s2657_s0, %s2445_s25  ;;  %s614_s26 = scalar_lea.vmem %s2658_s1, %s2676_s17 }
  0x17   : > { %v882_v21 = vld [vmem:[%s605_s29] sm:$0xff]  ;;  %v879_v13 = vld [vmem:[%s614_s26 + $0x8] sm:$0xff]  ;;  %s2284_s18 = smov 32   ;;  %s2289_s28 = smov 64  }
  0x18   : > { %2067 = vmatmul.mubr.msk.f32.vlgmr.msra.gmra.mrb[0].mxu1 %vm780_vm1, %v882_v21  ;;  %v878_v12 = vld [vmem:[%s614_s26] sm:$0xff]  ;;  %s633_s27 = scalar_lea.vmem %s2660_s3, %s2445_s25 }
  0x1a   : > { %2199 = vset.pattern.permute.xlu1 %v2279_v3  ;;  %2197 = vset.pattern.permute.xlu0 %v2279_v3 }
  0x1b   : > { %709 = vperm.xlu1 %2199, %v673_v1   ;;  %705 = vperm.xlu0 %2197, %v672_v2  }
  0x1f   : > { %2200 = vset.pattern.permute.xlu1 %v2280_v5  ;;  %2203 = vset.pattern.permute.xlu0 %v2278_v0 }
  0x20   : > { %733 = vperm.xlu1 %2200, %v672_v2   ;;  %693 = vperm.xlu0 %2203, %v675_v4  }
  0x24   : > { %2201 = vset.pattern.permute.xlu1 %v2278_v0  ;;  %2204 = vset.pattern.permute.xlu0 %v2280_v5 }
  0x25   : > { %688 = vperm.xlu1 %2201, %v674_v6   ;;  %737 = vperm.xlu0 %2204, %v673_v1  }
  0x29   : > { %2202 = vset.pattern.permute.xlu1 %v2279_v3  ;;  %745 = vperm.xlu0 %2204, %v675_v4  }
  0x2a   : > { %713 = vperm.xlu1 %2202, %v674_v6  }
  0x2e   : > { %717 = vperm.xlu1 %2202, %v675_v4  }
  0x32   : > { %2205 = vset.pattern.permute.xlu1 %v2280_v5 }
  0x33   : > { %741 = vperm.xlu1 %2205, %v674_v6  }
  0x95   : > { %v684_v26 = vpop.permute.xlu1 %683  ;;  %v679_v27 = vpop.permute.xlu0 %678 }
  0x96   : > { %v700_v32 = vmul.f32 %v699_v29, %v679_v27  ;;  %v701_v44 = vmul.f32 %v699_v29, %v684_v26  ;;  %v880_v26 = vld [vmem:[%s614_s26 + $0x10] sm:$0xff]  ;;  %v881_v27 = vld [vmem:[%s614_s26 + $0x18] sm:$0xff] }
  0x9a   : > { %v710_v33 = vpop.permute.xlu1 %709  ;;  %v706_v34 = vpop.permute.xlu0 %705 }
  0x9b   : > { %v724_v35 = vmul.f32 %v723_v31, %v706_v34  ;;  %v725_v41 = vmul.f32 %v723_v31, %v710_v33  ;;  %v664_v34 = vld [vmem:[%s2667_s10 + $0x10] sm:$0xff] }
  0x9d   : > { %v728_v37 = vadd.f32 %v724_v35, %v700_v32  ;;  %v729_v48 = vadd.f32 %v725_v41, %v701_v44  ;;  %v663_v32 = vld [vmem:[%s2667_s10 + $0x8] sm:$0xff]  ;;  %v665_v35 = vld [vmem:[%s2667_s10 + $0x18] sm:$0xff] }
  0x9f   : > { %v734_v38 = vpop.permute.xlu1 %733  ;;  %v694_v39 = vpop.permute.xlu0 %693 }
  0xa0   : > { %v752_v40 = vmul.f32 %v751_v36, %v734_v38  ;;  %v703_v57 = vmul.f32 %v699_v29, %v694_v39 }
  0xa2   : > { %v756_v43 = vadd.f32 %v752_v40, %v728_v37 }
  0xa4   : > { %v689_v45 = vpop.permute.xlu1 %688  ;;  %v738_v46 = vpop.permute.xlu0 %737  ;;  %v766_v47 = vadd.f32 %v1987_v42, %v756_v43 }
  0xa5   : > { %v753_v49 = vmul.f32 %v751_v36, %v738_v46  ;;  %v702_v62 = vmul.f32 %v699_v29, %v689_v45 }
  0xa6   : > { %v770_v50 = vmax.f32 %v766_v47, 0.0 }
  0xa7   : > { %v757_v51 = vadd.f32 %v753_v49, %v729_v48  ;;  %v2286_v48 = vmov 1966171168  }
  0xa8   : > { %2052 = vmatprep.mubr.msk.f32.mxu0 %vm780_vm1, %v770_v50  ;;  %v746_v55 = vpop.permute.xlu0 %745  ;;  %v1078_v49 = vunpack.c.l.s4 %v2286_v48 }
  0xa9   : > { %v767_v52 = vadd.f32 %v1987_v42, %v757_v51  ;;  %v714_v53 = vpop.permute.xlu1 %713  ;;  %v755_v59 = vmul.f32 %v751_v36, %v746_v55  ;;  %v1993_v51 = vld [vmem:[%s2666_s9] ss:$0 sm:$0xff] }
  0xaa   : > { %v726_v60 = vmul.f32 %v723_v31, %v714_v53  ;;  %v1079_v50 = vunpack.c.0.s8 %v1078_v49 }
  0xab   : > { %v771_v54 = vmax.f32 %v767_v52, 0.0 }
  0xac   : > { %v730_v1 = vadd.f32 %v726_v60, %v702_v62  ;;  %v1082_v53 = vsub.s32 %v1079_v50, %v2452_v23 }
  0xad   : > { %v718_v56 = vpop.permute.xlu1 %717  ;;  %2053 = vmatmul.mubr.msk.f32.vlgmr.msra.gmra.mrb[0].mxu0 %vm780_vm1, %v771_v54 }
  0xae   : > { %v727_v58 = vmul.f32 %v723_v31, %v718_v56  ;;  %2125 = vmatpush3.bf16.msra.mxu0 %v2117_v17  ;;  %v662_v31 = vld [vmem:[%s2667_s10] sm:$0xff] }
  0xaf   : > { %2127 = vmatprep.subr.bf16.mxu0 %v2120_v20  ;;  %v2130_v33 = vpack.c.bf16 %v663_v32, %v662_v31 }
  0xb0   : > { %v731_v61 = vadd.f32 %v727_v58, %v703_v57 }
  0xb1   : > { %2131 = vmatprep.subr.bf16.mxu1 %v2130_v33 }
  0xb2   : > { %v759_v63 = vadd.f32 %v755_v59, %v731_v61  ;;  %v742_v0 = vpop.permute.xlu1 %741  ;;  %2129 = vmatpush3.bf16.msra.mxu0 %v2120_v20  ;;  %2133 = vmatpush3.bf16.msra.mxu1 %v2130_v33 }
  0xb3   : > { %v754_v2 = vmul.f32 %v751_v36, %v742_v0  ;;  %2138 = vmatprep.subr.bf16.mxu0 %v2281_v16 }
  0xb4   : > { %v769_v4 = vadd.f32 %v1987_v42, %v759_v63 }
  0xb5   : > { %v758_v3 = vadd.f32 %v754_v2, %v730_v1 }
  0xb6   : > { %v773_v7 = vmax.f32 %v769_v4, 0.0 }
  0xb7   : > { %v768_v5 = vadd.f32 %v1987_v42, %v758_v3 }
  0xb9   : > { %v772_v6 = vmax.f32 %v768_v5, 0.0 }
  0xbb   : > { %2055 = vmatprep.mubr.msk.f32.mxu0 %vm780_vm1, %v772_v6 }
  0xbc   : > { %2056 = vmatmul.mubr.msk.f32.gmra.mrb[2].mxu0 %vm780_vm1, %v773_v7 }
  0xeb   : > { %v958_v18 = vpop.f32.mrb[0].mxu1 }
  0xec   : > { %v2068_v21 = vpop.f32.mrb[1].mxu1  ;;  %v959_v52 = vadd.f32 %v1993_v51, %v958_v18 }
  0xee   : > { %v1083_v54 = vrot.slane %v959_v52, %v1082_v53  ;;  %v1076_v59 = vcombine.high %v959_v52, %v959_v52 }
  0xf0   : > { %v1091_v55 = vcombine.high %v1083_v54, %v1083_v54  ;;  %v1099_v56 = vrot.slane %v1083_v54, %v1082_v53  ;;  %v1090_v62 = vrot.slane %v1076_v59, %v1082_v53 }
  0xf2   : > { %v1113_v57 = vrot.slane %v1091_v55, %v1082_v53  ;;  %v1121_v58 = vcombine.high %v1099_v56, %v1099_v56  ;;  %v1128_v63 = vrot.slane %v1099_v56, %v2455_v24  ;;  %v1092_v6 = vcombine.high %v1090_v62, %v1090_v62 }
  0xf4   : > { %v1123_v60 = vcombine.high %v1113_v57, %v1113_v57  ;;  %v1136_v61 = vrot.slane %v1121_v58, %v2455_v24  ;;  %v1132_v2 = vrot.slane %v1113_v57, %v2455_v24 }
  0xf6   : > { %v1140_v0 = vrot.slane %v1123_v60, %v2455_v24 }
 0x180   : > { %v2054_v9 = vpop.f32.mrb[0].mxu0 }
 0x181   : > { %v865_v10 = vadd.f32 %v2054_v9, %v1988_v8  ;;  %v859_v11 = vpop.f32.mrb[1].mxu0 }
 0x182   : > { %v860_v14 = vadd.f32 %v1988_v8, %v859_v11 }
 0x183   : > { %v963_v17 = vsub.f32 %v865_v10, %v879_v13 }
 0x184   : > { %v962_v15 = vsub.f32 %v860_v14, %v878_v12  ;;  %1565 = vrot.lane.b32.xlu1 %v860_v14, %s2284_s18  ;;  %v1120_v14 = vrot.slane %v1092_v6, %v1082_v53 }
 0x186   : > { %2077 = vmatprep.mubr.msk.f32.mxu0 %vm780_vm1, %v962_v15  ;;  %v1148_v33 = vrot.slane %v1120_v14, %v2455_v24 }
 0x187   : > { %2078 = vmatmul.mubr.msk.f32.vlgmr.msra.gmra.mrb[4].mxu0 %vm780_vm1, %v963_v17 }
 0x188   : > { %1567 = vrot.lane.b32.xlu1 %v865_v10, %s2284_s18  ;;  %v1106_v10 = vrot.slane %v1090_v62, %v1082_v53 }
 0x18a   : > { %v1122_v21 = vcombine.high %v1106_v10, %v1106_v10 }
 0x18f   : > { %v2057_v20 = vpop.f32.mrb[2].mxu0 }
 0x190   : > { %v875_v22 = vadd.f32 %v2057_v20, %v1988_v8  ;;  %v869_v25 = vpop.f32.mrb[3].mxu0 }
 0x191   : > { %v870_v28 = vadd.f32 %v1988_v8, %v869_v25  ;;  %v1152_v25 = vrot.slane %v1122_v21, %v2455_v24 }
 0x192   : > { %1571 = vrot.lane.b32.xlu1 %v875_v22, %s2284_s18  ;;  %v965_v30 = vsub.f32 %v875_v22, %v881_v27  ;;  %v1124_v22 = vcombine.high %v1120_v14, %v1120_v14 }
 0x193   : > { %v964_v29 = vsub.f32 %v870_v28, %v880_v26  ;;  %1569 = vrot.lane.b32.xlu0 %v870_v28, %s2284_s18  ;;  %v1144_v28 = vrot.slane %v1106_v10, %v2455_v24 }
 0x195   : > { %2080 = vmatprep.mubr.msk.f32.mxu0 %vm780_vm1, %v964_v29 }
 0x196   : > { %2081 = vmatmul.mubr.msk.f32.gmra.mrb[6].mxu0 %vm780_vm1, %v965_v30 }
 0x197   : > { %2105 = vmatprep.mubr.msk.f32.mxu0 %vm2282_vm0, %v2283_v19  ;;  %v2134_v19 = vpack.c.bf16 %v665_v35, %v664_v34 }
 0x199   : > { %2135 = vmatprep.subr.bf16.mxu1 %v2134_v19 }
 0x19a   : > { %2137 = vmatpush3.bf16.msra.mxu1 %v2134_v19 }
 0x1f6   : > { %v1566_v36 = vpop.permute.xlu1 %1565 }
 0x1f7   : > { %v1577_v39 = vadd.f32 %v1566_v36, %v878_v12 }
 0x1f9   : > { %v1585_v41 = vcombine.high %v1577_v39, %v1577_v39 }
 0x1fa   : > { %v1568_v37 = vpop.permute.xlu1 %1567 }
 0x1fb   : > { %v1578_v38 = vadd.f32 %v1568_v37, %v879_v13 }
 0x1fd   : > { %v1586_v40 = vcombine.high %v1578_v38, %v1578_v38  ;;  %1593 = vrot.lane.b32.xlu0 %v1578_v38, %s2285_s19 }
 0x1ff   : > { %1595 = vrot.lane.b32.xlu1 %v1586_v40, %s2285_s19 }
 0x201   : > { %1589 = vrot.lane.b32.xlu0 %v1577_v39, %s2285_s19 }
 0x203   : > { %1591 = vrot.lane.b32.xlu1 %v1585_v41, %s2285_s19 }
 0x204   : > { %v1572_v42 = vpop.permute.xlu1 %1571 }
 0x205   : > { %v1570_v43 = vpop.permute.xlu0 %1569  ;;  %v1580_v45 = vadd.f32 %v1572_v42, %v881_v27  ;;  %v667_v42 = vld [vmem:[%s2669_s12] sm:$0xff] }
 0x206   : > { %v1579_v44 = vadd.f32 %v1570_v43, %v880_v26  ;;  %v1156_v26 = vrot.slane %v1124_v22, %v2455_v24  ;;  %v668_v24 = vld [vmem:[%s2669_s12 + $0x8] sm:$0xff] }
 0x207   : > { %v1588_v47 = vcombine.high %v1580_v45, %v1580_v45  ;;  %v2139_v43 = vpack.c.bf16 %v668_v24, %v667_v42 }
 0x208   : > { %v1587_v46 = vcombine.high %v1579_v44, %v1579_v44  ;;  %1597 = vrot.lane.b32.xlu0 %v1579_v44, %s2285_s19  ;;  %v669_v44 = vld [vmem:[%s2669_s12 + $0x10] sm:$0xff] }
 0x209   : > { %2140 = vmatpush3.bf16.msra.mxu0 %v2139_v43 }
 0x20a   : > { %1599 = vrot.lane.b32.xlu1 %v1587_v46, %s2285_s19  ;;  %2141 = vmatprep.subr.bf16.mxu0 %v2281_v16 }
 0x20c   : > { %1601 = vrot.lane.b32.xlu0 %v1580_v45, %s2285_s19  ;;  %v670_v45 = vld [vmem:[%s2669_s12 + $0x18] sm:$0xff] }
 0x20d   : > { %v2142_v46 = vpack.c.bf16 %v670_v45, %v669_v44 }
 0x20e   : > { %1603 = vrot.lane.b32.xlu1 %v1588_v47, %s2285_s19  ;;  %v1999_v47 = vld [vmem:[%s2668_s11] ss:$0 sm:$0xff] }
 0x20f   : > { %2143 = vmatpush3.bf16.msra.mxu0 %v2142_v46 }
 0x25a   : > { %v2079_v1 = vpop.f32.mrb[4].mxu0 }
 0x25b   : > { %v1068_v3 = vcombine.high %v2079_v1, %v2079_v1  ;;  %v1167_v4 = vadd.f32 %v2079_v1, %v1136_v61  ;;  %v1044_v5 = vpop.f32.mrb[5].mxu0 }
 0x25c   : > { %v1067_v7 = vcombine.high %v1044_v5, %v1044_v5  ;;  %v1165_v8 = vadd.f32 %v1128_v63, %v1044_v5 }
 0x25d   : > { %v1168_v9 = vadd.f32 %v1140_v0, %v1068_v3  ;;  %v1175_v12 = vmax.f32 %v1167_v4, 0.0 }
 0x25e   : > { %v1166_v11 = vadd.f32 %v1132_v2, %v1067_v7  ;;  %v1173_v15 = vmax.f32 %v1165_v8, 0.0 }
 0x25f   : > { %v1176_v13 = vmax.f32 %v1168_v9, 0.0 }
 0x260   : > { %v1174_v17 = vmax.f32 %v1166_v11, 0.0 }
 0x261   : > { %v1196_v18 = vcombine.low %v1175_v12, %v1176_v13 }
 0x262   : > { %v1195_v20 = vcombine.low %v1173_v15, %v1174_v17 }
 0x264   : > { %2091 = vmatprep.mubr.msk.f32.mxu1 %vm780_vm1, %v1195_v20 }
 0x265   : > { %2092 = vmatmul.mubr.msk.f32.vlgmr.msra.gmra.mrb[2].mxu1 %vm780_vm1, %v1196_v18 }
 0x269   : > { %v2082_v27 = vpop.f32.mrb[6].mxu0 }
 0x26a   : > { %v1070_v29 = vcombine.high %v2082_v27, %v2082_v27  ;;  %v1171_v30 = vadd.f32 %v2082_v27, %v1152_v25  ;;  %v1054_v31 = vpop.f32.mrb[7].mxu0 }
 0x26b   : > { %v1069_v32 = vcombine.high %v1054_v31, %v1054_v31  ;;  %v1169_v34 = vadd.f32 %v1144_v28, %v1054_v31 }
 0x26c   : > { %v1172_v35 = vadd.f32 %v1156_v26, %v1070_v29  ;;  %v1179_v36 = vmax.f32 %v1171_v30, 0.0 }
 0x26d   : > { %v1170_v19 = vadd.f32 %v1148_v33, %v1069_v32  ;;  %v1177_v38 = vmax.f32 %v1169_v34, 0.0 }
 0x26e   : > { %v1180_v37 = vmax.f32 %v1172_v35, 0.0 }
 0x26f   : > { %v1178_v39 = vmax.f32 %v1170_v19, 0.0 }
 0x270   : > { %v1198_v40 = vcombine.low %v1179_v36, %v1180_v37 }
 0x271   : > { %v1197_v41 = vcombine.low %v1177_v38, %v1178_v39 }
 0x273   : > { %2094 = vmatprep.mubr.msk.f32.mxu1 %vm780_vm1, %v1197_v41 }
 0x274   : > { %2095 = vmatmul.mubr.msk.f32.gmra.mrb[4].mxu1 %vm780_vm1, %v1198_v40 }
 0x338   : > { %v2093_v48 = vpop.f32.mrb[2].mxu1 }
 0x339   : > { %v1279_v49 = vadd.f32 %v2093_v48, %v1999_v47  ;;  %v1273_v50 = vpop.f32.mrb[3].mxu1 }
 0x33a   : > { %v1274_v51 = vadd.f32 %v1999_v47, %v1273_v50 }
 0x33b   : > { %v1297_v16 = vcombine.high %v1279_v49, %v1279_v49  ;;  %v1306_v52 = vmul.f32 0.17677669, %v1279_v49 }
 0x33c   : > { %v1296_v53 = vcombine.high %v1274_v51, %v1274_v51  ;;  %v1304_v54 = vmul.f32 0.17677669, %v1274_v51 }
 0x33d   : > { %v1307_v55 = vmul.f32 0.17677669, %v1297_v16  ;;  %v1327_v56 = vsel %vm1312_vm2, %v1306_v52, -inf }
 0x33e   : > { %v1328_v57 = vrot.slane %v1327_v56, 4  ;;  %v1305_v58 = vmul.f32 0.17677669, %v1296_v53  ;;  %v1313_v59 = vsel %vm1312_vm2, %v1304_v54, -inf }
 0x33f   : > { %v1334_v60 = vsel %vm1312_vm2, %v1307_v55, -inf  ;;  %v1314_v61 = vrot.slane %v1313_v59, 4 }
 0x340   : > { %v1329_v62 = vmax.f32 %v1327_v56, %v1328_v57  ;;  %v1335_v63 = vrot.slane %v1334_v60, 4  ;;  %v1320_v0 = vsel %vm1312_vm2, %v1305_v58, -inf }
 0x341   : > { %v1315_v1 = vmax.f32 %v1313_v59, %v1314_v61  ;;  %v1321_v2 = vrot.slane %v1320_v0, 4 }
 0x342   : > { %v1330_v3 = vrot.slane %v1329_v62, 2  ;;  %v1336_v4 = vmax.f32 %v1334_v60, %v1335_v63 }
 0x343   : > { %v1316_v5 = vrot.slane %v1315_v1, 2  ;;  %v1322_v6 = vmax.f32 %v1320_v0, %v1321_v2 }
 0x344   : > { %v1331_v7 = vmax.f32 %v1329_v62, %v1330_v3  ;;  %v1337_v8 = vrot.slane %v1336_v4, 2 }
 0x345   : > { %v1317_v9 = vmax.f32 %v1315_v1, %v1316_v5  ;;  %v1323_v10 = vrot.slane %v1322_v6, 2 }
 0x346   : > { %v1332_v11 = vrot.slane %v1331_v7, 1  ;;  %v1338_v12 = vmax.f32 %v1336_v4, %v1337_v8 }
 0x347   : > { %v1318_v13 = vrot.slane %v1317_v9, 1  ;;  %v1324_v14 = vmax.f32 %v1322_v6, %v1323_v10  ;;  %v2096_v15 = vpop.f32.mrb[4].mxu1 }
 0x348   : > { %v1333_v17 = vmax.f32 %v1331_v7, %v1332_v11  ;;  %v1339_v18 = vrot.slane %v1338_v12, 1  ;;  %v1289_v20 = vadd.f32 %v2096_v15, %v1999_v47  ;;  %v1283_v21 = vpop.f32.mrb[5].mxu1 }
 0x349   : > { %v1319_v22 = vmax.f32 %v1317_v9, %v1318_v13  ;;  %v1325_v25 = vrot.slane %v1324_v14, 1  ;;  %v1284_v26 = vadd.f32 %v1999_v47, %v1283_v21 }
 0x34a   : > { %v1340_v27 = vmax.f32 %v1338_v12, %v1339_v18  ;;  %v1371_v28 = vsub.f32 %v1306_v52, %v1333_v17  ;;  %v1299_v29 = vcombine.high %v1289_v20, %v1289_v20  ;;  %v1310_v30 = vmul.f32 0.17677669, %v1289_v20 }
 0x34b   : > { %v1326_v31 = vmax.f32 %v1324_v14, %v1325_v25  ;;  %v1369_v32 = vsub.f32 %v1304_v54, %v1319_v22  ;;  %v1298_v33 = vcombine.high %v1284_v26, %v1284_v26  ;;  %v2545_v34 = vmul.f32 0.17677669, %v1284_v26 }
 0x34c   : > { %v1372_v35 = vsub.f32 %v1307_v55, %v1340_v27  ;;  %v1381_v19 = vmul.f32 1.442695, %v1371_v28  ;;  %v1311_v36 = vmul.f32 0.17677669, %v1299_v29  ;;  %v1355_v37 = vsel %vm1312_vm2, %v1310_v30, -inf }
 0x34d   : > { %v1370_v38 = vsub.f32 %v1305_v58, %v1326_v31  ;;  %v1377_v39 = vmul.f32 1.442695, %v1369_v32  ;;  %v1356_v40 = vrot.slane %v1355_v37, 4  ;;  %v1309_v41 = vmul.f32 0.17677669, %v1298_v33 }
 0x34e   : > { %2206 = vpow2.f32 %v1381_v19  ;;  %v1383_v42 = vmul.f32 1.442695, %v1372_v35  ;;  %v1362_v24 = vsel %vm1312_vm2, %v1311_v36, -inf  ;;  %v1341_v43 = vsel %vm1312_vm2, %v2545_v34, -inf }
 0x34f   : > { %2208 = vpow2.f32 %v1377_v39  ;;  %v1379_v44 = vmul.f32 1.442695, %v1370_v38  ;;  %v1357_v45 = vmax.f32 %v1355_v37, %v1356_v40  ;;  %v1363_v46 = vrot.slane %v1362_v24, 4 }
 0x350   : > { %2210 = vpow2.f32 %v1383_v42  ;;  %v1342_v47 = vrot.slane %v1341_v43, 4  ;;  %v1348_v48 = vsel %vm1312_vm2, %v1309_v41, -inf }
 0x351   : > { %2212 = vpow2.f32 %v1379_v44  ;;  %v1358_v49 = vrot.slane %v1357_v45, 2  ;;  %v1364_v50 = vmax.f32 %v1362_v24, %v1363_v46  ;;  %v1349_v51 = vrot.slane %v1348_v48, 4 }
 0x352   : > { %v1343_v16 = vmax.f32 %v1341_v43, %v1342_v47 }
 0x353   : > { %v1359_v52 = vmax.f32 %v1357_v45, %v1358_v49  ;;  %v1365_v53 = vrot.slane %v1364_v50, 2  ;;  %v1350_v54 = vmax.f32 %v1348_v48, %v1349_v51  ;;  %v2287_v51 = vmov 1983009808  }
 0x354   : > { %v1344_v55 = vrot.slane %v1343_v16, 2 }
 0x355   : > { %v1360_v56 = vrot.slane %v1359_v52, 1  ;;  %v1366_v57 = vmax.f32 %v1364_v50, %v1365_v53  ;;  %v1351_v58 = vrot.slane %v1350_v54, 2 }
 0x356   : > { %v1345_v59 = vmax.f32 %v1343_v16, %v1344_v55  ;;  %v1467_v16 = vunpack.c.l.s4 %v2287_v51 }
 0x357   : > { %v1361_v60 = vmax.f32 %v1359_v52, %v1360_v56  ;;  %v1367_v61 = vrot.slane %v1366_v57, 1  ;;  %v1352_v62 = vmax.f32 %v1350_v54, %v1351_v58  ;;  %v1594_v56 = vpop.permute.xlu0 %1593 }
 0x358   : > { %v2552_v63 = vpop.eup %2206  ;;  %v1346_v0 = vrot.slane %v1345_v59, 1 }
 0x359   : > { %v2554_v1 = vpop.eup %2208  ;;  %v1407_v2 = vsel %vm1312_vm2, %v2552_v63, 0.0  ;;  %v1368_v3 = vmax.f32 %v1366_v57, %v1367_v61  ;;  %v1375_v4 = vsub.f32 %v1310_v30, %v1361_v60  ;;  %v1353_v5 = vrot.slane %v1352_v62, 1 }
 0x35a   : > { %v2558_v6 = vpop.eup %2210  ;;  %v1408_v7 = vrot.slane %v1407_v2, 4  ;;  %v1393_v8 = vsel %vm1312_vm2, %v2554_v1, 0.0  ;;  %v1347_v9 = vmax.f32 %v1345_v59, %v1346_v0  ;;  %v1596_v0 = vpop.permute.xlu1 %1595 }
 0x35b   : > { %v2562_v10 = vpop.eup %2212  ;;  %v1414_v11 = vsel %vm1312_vm2, %v2558_v6, 0.0  ;;  %v1394_v12 = vrot.slane %v1393_v8, 4  ;;  %v1376_v13 = vsub.f32 %v1311_v36, %v1368_v3  ;;  %v1389_v14 = vmul.f32 1.442695, %v1375_v4 }
 0x35c   : > { %v1409_v15 = vadd.f32 %v1408_v7, %v1407_v2  ;;  %v1415_v17 = vrot.slane %v1414_v11, 4  ;;  %v1400_v18 = vsel %vm1312_vm2, %v2562_v10, 0.0  ;;  %v1354_v20 = vmax.f32 %v1352_v62, %v1353_v5 }
 0x35d   : > { %v1395_v21 = vadd.f32 %v1394_v12, %v1393_v8  ;;  %v1401_v22 = vrot.slane %v1400_v18, 4  ;;  %2214 = vpow2.f32 %v1389_v14  ;;  %v1391_v25 = vmul.f32 1.442695, %v1376_v13 }
 0x35e   : > { %v1410_v26 = vrot.slane %v1409_v15, 2  ;;  %v1416_v27 = vadd.f32 %v1415_v17, %v1414_v11  ;;  %v1373_v28 = vsub.f32 %v2545_v34, %v1347_v9  ;;  %v1374_v29 = vsub.f32 %v1309_v41, %v1354_v20 }
 0x35f   : > { %v1396_v30 = vrot.slane %v1395_v21, 2  ;;  %v1402_v31 = vadd.f32 %v1401_v22, %v1400_v18  ;;  %2216 = vpow2.f32 %v1391_v25  ;;  %v1468_v62 = vunpack.c.0.s8 %v1467_v16 }
 0x360   : > { %v1411_v32 = vadd.f32 %v1410_v26, %v1409_v15  ;;  %v1417_v33 = vrot.slane %v1416_v27, 2  ;;  %v1385_v35 = vmul.f32 1.442695, %v1373_v28  ;;  %v1387_v19 = vmul.f32 1.442695, %v1374_v29 }
 0x361   : > { %v1397_v36 = vadd.f32 %v1396_v30, %v1395_v21  ;;  %v1403_v37 = vrot.slane %v1402_v31, 2  ;;  %v2588_v18 = vsub.s32 %v1468_v62, %v2452_v23  ;;  %v1590_v21 = vpop.permute.xlu0 %1589 }
 0x362   : > { %v1412_v38 = vrot.slane %v1411_v32, 1  ;;  %v1418_v39 = vadd.f32 %v1417_v33, %v1416_v27  ;;  %2218 = vpow2.f32 %v1385_v35 }
 0x363   : > { %v1398_v40 = vrot.slane %v1397_v36, 1  ;;  %v1404_v42 = vadd.f32 %v1403_v37, %v1402_v31  ;;  %2220 = vpow2.f32 %v1387_v19 }
 0x364   : > { %v1413_v24 = vadd.f32 %v1412_v38, %v1411_v32  ;;  %v1419_v43 = vrot.slane %v1418_v39, 1 }
 0x365   : > { %v1399_v44 = vadd.f32 %v1398_v40, %v1397_v36  ;;  %v1405_v34 = vrot.slane %v1404_v42, 1 }
 0x366   : > { %v1420_v41 = vadd.f32 %v1419_v43, %v1418_v39  ;;  %2222 = vrcp.f32 %v1413_v24 }
 0x367   : > { %v2569_v45 = vpop.eup %2214  ;;  %v1406_v46 = vadd.f32 %v1405_v34, %v1404_v42  ;;  %2224 = vrcp.f32 %v1399_v44 }
 0x368   : > { %2226 = vrcp.f32 %v1420_v41  ;;  %v1435_v47 = vsel %vm1312_vm2, %v2569_v45, 0.0 }
 0x369   : > { %v2573_v48 = vpop.eup %2216  ;;  %2228 = vrcp.f32 %v1406_v46  ;;  %v1436_v49 = vrot.slane %v1435_v47, 4 }
 0x36a   : > { %v1442_v50 = vsel %vm1312_vm2, %v2573_v48, 0.0 }
 0x36b   : > { %v1437_v52 = vadd.f32 %v1436_v49, %v1435_v47  ;;  %v1443_v53 = vrot.slane %v1442_v50, 4 }
 0x36c   : > { %v2577_v54 = vpop.eup %2218 }
 0x36d   : > { %v2579_v55 = vpop.eup %2220  ;;  %v1438_v57 = vrot.slane %v1437_v52, 2  ;;  %v1444_v58 = vadd.f32 %v1443_v53, %v1442_v50  ;;  %v1421_v59 = vsel %vm1312_vm2, %v2577_v54, 0.0  ;;  %v1598_v50 = vpop.permute.xlu0 %1597 }
 0x36e   : > { %v1422_v60 = vrot.slane %v1421_v59, 4  ;;  %v1428_v61 = vsel %vm1312_vm2, %v2579_v55, 0.0 }
 0x36f   : > { %v1439_v2 = vadd.f32 %v1438_v57, %v1437_v52  ;;  %v1445_v3 = vrot.slane %v1444_v58, 2  ;;  %v1429_v4 = vrot.slane %v1428_v61, 4 }
 0x370   : > { %v2223_v5 = vpop.eup %2222  ;;  %v1423_v7 = vadd.f32 %v1422_v60, %v1421_v59 }
 0x371   : > { %v2225_v8 = vpop.eup %2224  ;;  %v1440_v9 = vrot.slane %v1439_v2, 1  ;;  %v1446_v11 = vadd.f32 %v1445_v3, %v1444_v58  ;;  %v1430_v12 = vadd.f32 %v1429_v4, %v1428_v61  ;;  %v1459_v13 = vmul.f32 %v2223_v5, %v2552_v63  ;;  %v1592_v63 = vpop.permute.xlu1 %1591 }
 0x372   : > { %v2227_v14 = vpop.eup %2226  ;;  %v1424_v15 = vrot.slane %v1423_v7, 2  ;;  %v1457_v17 = vmul.f32 %v2225_v8, %v2554_v1  ;;  %v2288_v4 = vmov 1934713408  }
 0x373   : > { %v2229_v20 = vpop.eup %2228  ;;  %v1441_v22 = vadd.f32 %v1440_v9, %v1439_v2  ;;  %v1447_v25 = vrot.slane %v1446_v11, 1  ;;  %v1431_v26 = vrot.slane %v1430_v12, 2  ;;  %v1460_v27 = vmul.f32 %v2227_v14, %v2558_v6 }
 0x374   : > { %v1425_v28 = vadd.f32 %v1424_v15, %v1423_v7  ;;  %v1458_v29 = vmul.f32 %v2229_v20, %v2562_v10  ;;  %v1465_v30 = vcombine.low %v1457_v17, %v1459_v13  ;;  %v1613_v31 = vmul.f32 %v1590_v21, %v1457_v17 }
 0x375   : > { %v1448_v32 = vadd.f32 %v1447_v25, %v1446_v11  ;;  %2230 = vrcp.f32 %v1441_v22  ;;  %v1432_v33 = vadd.f32 %v1431_v26, %v1430_v12  ;;  %v1615_v1 = vmul.f32 %v1594_v56, %v1459_v13  ;;  %v1600_v57 = vpop.permute.xlu1 %1599  ;;  %v1602_v11 = vpop.permute.xlu0 %1601 }
 0x376   : > { %v1426_v35 = vrot.slane %v1425_v28, 1  ;;  %v2593_v19 = vrot.slane %v1465_v30, %v2588_v18  ;;  %v1473_v36 = vcombine.low %v1458_v29, %v1460_v27  ;;  %v1614_v37 = vmul.f32 %v1592_v63, %v1458_v29 }
 0x377   : > { %2232 = vrcp.f32 %v1448_v32  ;;  %v1433_v38 = vrot.slane %v1432_v33, 1  ;;  %v1616_v39 = vmul.f32 %v1596_v0, %v1460_v27  ;;  %v1621_v6 = vsel %vm1312_vm2, %v1613_v31, 0.0 }
 0x378   : > { %v1427_v40 = vadd.f32 %v1426_v35, %v1425_v28  ;;  %v2597_v10 = vrot.slane %v1473_v36, %v2588_v18  ;;  %v1622_v42 = vrot.slane %v1621_v6, 4  ;;  %v1628_v24 = vsel %vm1312_vm2, %v1614_v37, 0.0 }
 0x379   : > { %v1434_v43 = vadd.f32 %v1433_v38, %v1432_v33  ;;  %v1629_v44 = vrot.slane %v1628_v24, 4  ;;  %v1635_v34 = vsel %vm1312_vm2, %v1615_v1, 0.0  ;;  %v1642_v41 = vsel %vm1312_vm2, %v1616_v39, 0.0  ;;  %v1604_v20 = vpop.permute.xlu1 %1603 }
 0x37a   : > { %2234 = vrcp.f32 %v1427_v40  ;;  %v1482_v46 = vcombine.high %v2593_v19, %v2597_v10  ;;  %v1623_v47 = vadd.f32 %v1622_v42, %v1621_v6  ;;  %v1636_v49 = vrot.slane %v1635_v34, 4 }
 0x37b   : > { %2236 = vrcp.f32 %v1434_v43  ;;  %v1630_v51 = vadd.f32 %v1629_v44, %v1628_v24  ;;  %v1643_v16 = vrot.slane %v1642_v41, 4  ;;  %v1481_v52 = vcombine.low %v2593_v19, %v2597_v10 }
 0x37c   : > { %v1624_v53 = vrot.slane %v1623_v47, 2  ;;  %v1637_v56 = vadd.f32 %v1636_v49, %v1635_v34  ;;  %v1484_v5 = vunpack.c.l.s4 %v2288_v4 }
 0x37d   : > { %v1631_v58 = vrot.slane %v1630_v51, 2  ;;  %v1644_v59 = vadd.f32 %v1643_v16, %v1642_v41 }
 0x37e   : > { %v1625_v60 = vadd.f32 %v1624_v53, %v1623_v47  ;;  %v1638_v61 = vrot.slane %v1637_v56, 2 }
 0x37f   : > { %v2231_v62 = vpop.eup %2230  ;;  %v1632_v0 = vadd.f32 %v1631_v58, %v1630_v51  ;;  %v1645_v2 = vrot.slane %v1644_v59, 2 }
 0x380   : > { %v1463_v3 = vmul.f32 %v2231_v62, %v2569_v45  ;;  %v1626_v7 = vrot.slane %v1625_v60, 1  ;;  %v1639_v8 = vadd.f32 %v1638_v61, %v1637_v56  ;;  %v1485_v45 = vunpack.c.0.s8 %v1484_v5 }
 0x381   : > { %v2233_v9 = vpop.eup %2232  ;;  %v1633_v12 = vrot.slane %v1632_v0, 1  ;;  %v1646_v13 = vadd.f32 %v1645_v2, %v1644_v59 }
 0x382   : > { %v1464_v14 = vmul.f32 %v2233_v9, %v2573_v48  ;;  %v1619_v15 = vmul.f32 %v1602_v11, %v1463_v3  ;;  %v1640_v17 = vrot.slane %v1639_v8, 1  ;;  %v1627_v21 = vadd.f32 %v1626_v7, %v1625_v60 }
 0x383   : > { %v1634_v22 = vadd.f32 %v1633_v12, %v1632_v0  ;;  %v1647_v25 = vrot.slane %v1646_v13, 1  ;;  %v1488_v24 = vsub.s32 %v1485_v45, %v2452_v23 }
 0x384   : > { %v2235_v26 = vpop.eup %2234  ;;  %v1620_v27 = vmul.f32 %v1604_v20, %v1464_v14  ;;  %v1641_v28 = vadd.f32 %v1640_v17, %v1639_v8  ;;  %v1663_v29 = vsel %vm1312_vm2, %v1619_v15, 0.0 }
 0x385   : > { %v2237_v30 = vpop.eup %2236  ;;  %v1461_v31 = vmul.f32 %v2235_v26, %v2577_v54  ;;  %v1664_v63 = vrot.slane %v1663_v29, 4  ;;  %v1692_v32 = vsel %vm1691_vm3, %v1634_v22, %v1627_v21  ;;  %v1648_v33 = vadd.f32 %v1647_v25, %v1646_v13 }
 0x386   : > { %v1462_v48 = vmul.f32 %v2237_v30, %v2579_v55  ;;  %v1670_v1 = vsel %vm1312_vm2, %v1620_v27, 0.0  ;;  %v1694_v35 = vsel %vm1693_vm4, %v1641_v28, %v1692_v32  ;;  %v1496_v23 = vrot.slane %v1482_v46, %v1488_v24  ;;  %v2006_v27 = vld [vmem:[%s2670_s13] ss:$0 sm:$0xff] }
 0x387   : > { %v1499_v36 = vcombine.low %v1461_v31, %v1463_v3  ;;  %v1617_v37 = vmul.f32 %v1598_v50, %v1461_v31  ;;  %v1665_v38 = vadd.f32 %v1664_v63, %v1663_v29  ;;  %v1671_v39 = vrot.slane %v1670_v1, 4  ;;  %v1777_v29 = vld [vmem:[%s633_s27] sm:$0xff] }
 0x388   : > { %v1507_v6 = vcombine.low %v1462_v48, %v1464_v14  ;;  %v1618_v40 = vmul.f32 %v1600_v57, %v1462_v48  ;;  %v1696_v42 = vsel %vm1695_vm5, %v1648_v33, %v1694_v35  ;;  %v1489_v57 = vrot.slane %v1481_v52, %v1488_v24 }
 0x389   : > { %v1506_v54 = vrot.slane %v1499_v36, %v2588_v18  ;;  %v1649_v43 = vsel %vm1312_vm2, %v1617_v37, 0.0  ;;  %v1672_v44 = vadd.f32 %v1671_v39, %v1670_v1  ;;  %v1666_v47 = vrot.slane %v1665_v38, 2 }
 0x38a   : > { %v1514_v55 = vrot.slane %v1507_v6, %v2588_v18  ;;  %v1650_v34 = vrot.slane %v1649_v43, 4  ;;  %v1656_v41 = vsel %vm1312_vm2, %v1618_v40, 0.0 }
 0x38b   : > { %v1657_v49 = vrot.slane %v1656_v41, 4  ;;  %v1673_v50 = vrot.slane %v1672_v44, 2  ;;  %v1667_v60 = vadd.f32 %v1666_v47, %v1665_v38 }
 0x38c   : > { %v1516_v51 = vcombine.high %v1506_v54, %v1514_v55  ;;  %v1651_v16 = vadd.f32 %v1650_v34, %v1649_v43  ;;  %v1515_v53 = vcombine.low %v1506_v54, %v1514_v55 }
 0x38d   : > { %v1658_v56 = vadd.f32 %v1657_v49, %v1656_v41  ;;  %v1674_v62 = vadd.f32 %v1673_v50, %v1672_v44  ;;  %v1668_v8 = vrot.slane %v1667_v60, 1 }
 0x38e   : > { %v1530_v58 = vrot.slane %v1516_v51, %v1488_v24  ;;  %v1652_v18 = vrot.slane %v1651_v16, 2  ;;  %v1523_v59 = vrot.slane %v1515_v53, %v1488_v24 }
 0x38f   : > { %v1659_v61 = vrot.slane %v1658_v56, 2  ;;  %v1675_v10 = vrot.slane %v1674_v62, 1  ;;  %v1669_v11 = vadd.f32 %v1668_v8, %v1667_v60 }
 0x390   : > { %v1545_v0 = vcombine.low %v1496_v23, %v1530_v58  ;;  %v1653_v2 = vadd.f32 %v1652_v18, %v1651_v16  ;;  %v2004_v3 = vcombine.high %v1489_v57, %v1523_v59  ;;  %v2005_v4 = vcombine.high %v1496_v23, %v1530_v58 }
 0x391   : > { %v1660_v5 = vadd.f32 %v1659_v61, %v1658_v56  ;;  %v1535_v7 = vcombine.low %v1489_v57, %v1523_v59  ;;  %v1676_v13 = vadd.f32 %v1675_v10, %v1674_v62 }
 0x392   : > { %1546 = vrot.lane.b32.xlu1 %v1545_v0, %s2289_s28  ;;  %1540 = vrot.lane.b32.xlu0 %v2004_v3, %s2284_s18  ;;  %v1654_v46 = vrot.slane %v1653_v2, 1  ;;  %s641_s18 = scalar_lea.vmem %s2671_s14, %s2445_s25 }
 0x393   : > { %v1661_v19 = vrot.slane %v1660_v5, 1 }
 0x394   : > { %v1655_v52 = vadd.f32 %v1654_v46, %v1653_v2 }
 0x395   : > { %v1662_v9 = vadd.f32 %v1661_v19, %v1660_v5 }
 0x396   : > { %1552 = vrot.lane.b32.xlu0 %v2005_v4, %s2285_s19  ;;  %v1698_v12 = vsel %vm1697_vm6, %v1655_v52, %v1696_v42  ;;  %s649_s19 = scalar_lea.vmem %s2672_s15, %s2445_s25 }
 0x397   : > { %v1700_v14 = vsel %vm1699_vm7, %v1662_v9, %v1698_v12 }
 0x398   : > { %v1702_v15 = vsel %vm1701_vm8, %v1669_v11, %v1700_v14 }
 0x399   : > { %v1704_v17 = vsel %vm1703_vm9, %v1676_v13, %v1702_v15 }
 0x39a   : > { %2106 = vmatmul.mubr.msk.f32.vlgmr.msra.gmra.mrb[8].mxu0 %vm780_vm1, %v1704_v17 }
 0x404   : > { %v1541_v20 = vpop.permute.xlu0 %1540  ;;  %v1547_v21 = vpop.permute.xlu1 %1546 }
 0x405   : > { %v1555_v22 = vsel %vm780_vm1, %v1535_v7, %v1541_v20 }
 0x406   : > { %v1557_v26 = vsel %vm1556_vm10, %v1555_v22, %v1547_v21 }
 0x408   : > { %v1553_v25 = vpop.permute.xlu0 %1552 }
 0x409   : > { %v1559_v45 = vsel %vm1558_vm11, %v1557_v26, %v1553_v25 }
 0x40a   : > { %1560 = vst [vmem:[%s649_s19] sm:$0xff] %v1559_v45 }
 0x46d   : > { %v1773_v28 = vpop.f32.mrb[8].mxu0 }
 0x46e   : > { %v1774_v30 = vadd.f32 %v2006_v27, %v1773_v28  ;;  %v2107_v31 = vpop.f32.mrb[9].mxu0 }
 0x470   : > { %v1778_v63 = vadd.f32 %v1777_v29, %v1774_v30 }
 0x472   : > { %1780 = vst.msk [vmem:[%s641_s18] sm:$0xff] %vm1779_vm12, %v1778_v63 }
 0x473 PF: > { %s26_s22 = sadd.s32 1, %s2276_s22   ;;  %s2677_s18 = smov %s2268_s20 }
 0x474   : > { %p23_p8 = scmp.ge.s32.totalorder %s26_s22, 6   ;;  %s2678_s19 = smov %s2272_s21 }
 0x475   : > { %s2679_s20 = smov %s2682_s23  ;;  %s2680_s21 = smov %s2686_s24 }
 0x476   :  { %25 = sbr.rel (!%p23_p8) target bundleno = 3 (0x3), region = 127 }

</bundles_post_ra>
